<compile_context>
chip_gen: v5e
topology: v5e:2x2
jax: 0.10.0
libtpu: 0.0.40
codegen_flags: <defaults>
</compile_context>

<pallas_src>
import jax
import jax.numpy as jnp
from jax.experimental import pallas as pl
from jax.experimental.pallas import tpu as pltpu


_VMEM_LIMIT = 32 * 1024 * 1024  # explicit scoped-VMEM budget (safe on v5e/v6e/v7x)


def _pick_row_tile(h, target=8):
    """Largest divisor of h that is a multiple of 8 and <= target, else full h."""
    for d in range(min(h, target), 0, -1):
        if h % d == 0 and d % 8 == 0:
            return d
    return h


# ----------------------------------------------------------------- stage 1: cv1

def _cv1_kernel(xm_ref, xt_ref, xb_ref, w_ref, b_ref, o_ref, xpad_ref):
    # xm_ref : (1, TH, W, Cin)  main row tile (f32)
    # xt_ref : (1, 1, W, Cin)   row above the tile (clamped index map)
    # xb_ref : (1, 1, W, Cin)   row below the tile (clamped index map)
    # w_ref  : (9*Cin, Cout)    bf16, BN scale folded, (ky,kx,ci) row order
    # b_ref  : (1, Cout)        f32 folded BN bias
    # o_ref  : (1, TH, W, Cout) bf16
    # xpad_ref: VMEM (TH+2, W+2, Cin) bf16 -- zero-padded + halo'd input tile
    _, TH, W, Cin = xm_ref.shape
    Cout = o_ref.shape[3]
    t = pl.program_id(1)
    nt = pl.num_programs(1)

    # left/right zero-pad columns (rewritten every step: megacore-safe)
    xpad_ref[:, 0:1, :] = jnp.zeros((TH + 2, 1, Cin), xpad_ref.dtype)
    xpad_ref[:, W + 1:W + 2, :] = jnp.zeros((TH + 2, 1, Cin), xpad_ref.dtype)

    # interior rows
    xpad_ref[1:TH + 1, 1:W + 1, :] = xm_ref[0].astype(xpad_ref.dtype)

    # top halo row (zero at the global top boundary)
    @pl.when(t > 0)
    def _():
        xpad_ref[0:1, 1:W + 1, :] = xt_ref[0].astype(xpad_ref.dtype)

    @pl.when(t == 0)
    def _():
        xpad_ref[0:1, 1:W + 1, :] = jnp.zeros((1, W, Cin), xpad_ref.dtype)

    # bottom halo row (zero at the global bottom boundary)
    @pl.when(t < nt - 1)
    def _():
        xpad_ref[TH + 1:TH + 2, 1:W + 1, :] = xb_ref[0].astype(xpad_ref.dtype)

    @pl.when(t == nt - 1)
    def _():
        xpad_ref[TH + 1:TH + 2, 1:W + 1, :] = jnp.zeros((1, W, Cin), xpad_ref.dtype)

    # im2col -> single MXU matmul against (9*Cin, Cout)
    cols = []
    for ky in range(3):
        for kx in range(3):
            cols.append(xpad_ref[ky:ky + TH, kx:kx + W, :].reshape(TH * W, Cin))
    patch = jnp.concatenate(cols, axis=1)                       # (TH*W, 9*Cin) bf16
    acc = jnp.dot(patch, w_ref[...], preferred_element_type=jnp.float32)
    y = acc + b_ref[0][None, :]
    y = y * jax.nn.sigmoid(y)                                   # SiLU
    o_ref[0] = y.reshape(TH, W, Cout).astype(o_ref.dtype)


def conv3x3_bn_silu(x, w_folded, bias, th):
    N, H, W, Cin = x.shape
    Cout = w_folded.shape[-1]
    nt = H // th
    return pl.pallas_call(
        _cv1_kernel,
        out_shape=jax.ShapeDtypeStruct((N, H, W, Cout), jnp.bfloat16),
        grid=(N, nt),
        in_specs=[
            pl.BlockSpec((1, th, W, Cin), lambda n, t: (n, t, 0, 0)),
            pl.BlockSpec((1, 1, W, Cin),
                         lambda n, t: (n, jnp.maximum(t * th - 1, 0), 0, 0)),
            pl.BlockSpec((1, 1, W, Cin),
                         lambda n, t: (n, jnp.minimum(t * th + th, H - 1), 0, 0)),
            pl.BlockSpec((9 * Cin, Cout), lambda n, t: (0, 0)),
            pl.BlockSpec((1, Cout), lambda n, t: (0, 0)),
        ],
        out_specs=pl.BlockSpec((1, th, W, Cout), lambda n, t: (n, t, 0, 0)),
        scratch_shapes=[pltpu.VMEM((th + 2, W + 2, Cin), jnp.bfloat16)],
        compiler_params=pltpu.CompilerParams(
            dimension_semantics=("parallel", "parallel"),
            vmem_limit_bytes=_VMEM_LIMIT),
    )(x, x, x, w_folded, bias)


# ------------------------------------------- stage 2: upsample + cv2 + cv3 fused

def _up_cv2_cv3_kernel(xm_ref, xt_ref, xb_ref, wup_ref, bup_ref,
                       wc2_ref, bc2_ref, wc3_ref, bc3_ref, o_ref,
                       xin_ref, u_ref):
    # xm_ref : (1, TH, W, C)  cv1-output row tile (bf16); halos: (1, 1, W, C)
    # wup_ref: (4, C, C)  bf16, index = a*2+b (ConvTranspose 2x2 s2 phases)
    # bup_ref: (1, C) f32
    # wc2_ref: (9*C, C) bf16 (BN scale folded) ; bc2_ref: (1, C) f32
    # wc3_ref: (C, C2)  bf16 (BN scale folded) ; bc3_ref: (1, C2) f32
    # o_ref  : (2, 2, 1, TH, W*C2) f32 -- phase-major, lane-dense output
    # xin_ref: VMEM (TH+2, W, C) bf16     input rows incl. 1-row halo
    # u_ref  : VMEM (2, 2, TH+2, W+2, C) bf16
    #          u[a, b, k, 1+j] = U[2*(r0-1+k)+a, 2*j+b]  (U = upsampled tensor)
    _, TH, W, C = xm_ref.shape
    C2 = wc3_ref.shape[1]
    t = pl.program_id(1)
    nt = pl.num_programs(1)

    # ---- assemble input rows with a 1-row halo ------------------------------
    xin_ref[1:TH + 1, :, :] = xm_ref[0].astype(xin_ref.dtype)

    @pl.when(t > 0)
    def _():
        xin_ref[0:1, :, :] = xt_ref[0].astype(xin_ref.dtype)

    @pl.when(t == 0)
    def _():
        xin_ref[0:1, :, :] = jnp.zeros((1, W, C), xin_ref.dtype)

    @pl.when(t < nt - 1)
    def _():
        xin_ref[TH + 1:TH + 2, :, :] = xb_ref[0].astype(xin_ref.dtype)

    @pl.when(t == nt - 1)
    def _():
        xin_ref[TH + 1:TH + 2, :, :] = jnp.zeros((1, W, C), xin_ref.dtype)

    # ---- ConvTranspose2d(k=2, s=2): 4 phase matmuls, phase-separated in VMEM -
    x2d = xin_ref[...].reshape((TH + 2) * W, C)
    bup = bup_ref[0][None, :]
    for a in range(2):
        for b in range(2):
            yz = jnp.dot(x2d, wup_ref[a * 2 + b],
                         preferred_element_type=jnp.float32) + bup
            u_ref[a, b, :, 1:W + 1, :] = yz.reshape(TH + 2, W, C).astype(u_ref.dtype)
            # left/right zero pad columns for the following 3x3 conv
            u_ref[a, b, :, 0:1, :] = jnp.zeros((TH + 2, 1, C), u_ref.dtype)
            u_ref[a, b, :, W + 1:W + 2, :] = jnp.zeros((TH + 2, 1, C), u_ref.dtype)

    # U rows that fall outside [0, 2H) are conv zero padding -> clear them
    @pl.when(t == 0)
    def _():
        for a in range(2):
            for b in range(2):
                u_ref[a, b, 0:1, :, :] = jnp.zeros((1, W + 2, C), u_ref.dtype)

    @pl.when(t == nt - 1)
    def _():
        for a in range(2):
            for b in range(2):
                u_ref[a, b, TH + 1:TH + 2, :, :] = jnp.zeros((1, W + 2, C), u_ref.dtype)

    # ---- cv2 (3x3 on U) + cv3 (1x1), per output phase (alpha, beta) ----------
    bc2 = bc2_ref[0][None, :]
    bc3 = bc3_ref[0][None, :]
    for alpha in range(2):
        for beta in range(2):
            cols = []
            for dy in (-1, 0, 1):
                a = (alpha + dy) % 2
                ks = 1 + (alpha + dy - a) // 2
                for dx in (-1, 0, 1):
                    b = (beta + dx) % 2
                    js = 1 + (beta + dx - b) // 2
                    cols.append(
                        u_ref[a, b, ks:ks + TH, js:js + W, :].reshape(TH * W, C))
            patch = jnp.concatenate(cols, axis=1)               # (TH*W, 9*C) bf16
            h = jnp.dot(patch, wc2_ref[...],
                        preferred_element_type=jnp.float32) + bc2
            h = h * jax.nn.sigmoid(h)                           # SiLU (cv2)
            z = jnp.dot(h.astype(wc3_ref.dtype), wc3_ref[...],
                        preferred_element_type=jnp.float32) + bc3
            z = z * jax.nn.sigmoid(z)                           # SiLU (cv3)
            # lane-dense store: last dim = W*C2 (multiple of 128 at real sizes)
            o_ref[alpha, beta, 0] = z.reshape(TH, W * C2).astype(o_ref.dtype)


def upsample_cv2_cv3(x, wup, bup, wc2, bc2, wc3, bc3, th):
    N, H, W, C = x.shape
    C2 = wc3.shape[-1]
    nt = H // th
    out = pl.pallas_call(
        _up_cv2_cv3_kernel,
        out_shape=jax.ShapeDtypeStruct((2, 2, N, H, W * C2), jnp.float32),
        grid=(N, nt),
        in_specs=[
            pl.BlockSpec((1, th, W, C), lambda n, t: (n, t, 0, 0)),
            pl.BlockSpec((1, 1, W, C),
                         lambda n, t: (n, jnp.maximum(t * th - 1, 0), 0, 0)),
            pl.BlockSpec((1, 1, W, C),
                         lambda n, t: (n, jnp.minimum(t * th + th, H - 1), 0, 0)),
            pl.BlockSpec((4, C, C), lambda n, t: (0, 0, 0)),
            pl.BlockSpec((1, C), lambda n, t: (0, 0)),
            pl.BlockSpec((9 * C, C), lambda n, t: (0, 0)),
            pl.BlockSpec((1, C), lambda n, t: (0, 0)),
            pl.BlockSpec((C, C2), lambda n, t: (0, 0)),
            pl.BlockSpec((1, C2), lambda n, t: (0, 0)),
        ],
        out_specs=pl.BlockSpec((2, 2, 1, th, W * C2), lambda n, t: (0, 0, n, t, 0)),
        scratch_shapes=[
            pltpu.VMEM((th + 2, W, C), jnp.bfloat16),
            pltpu.VMEM((2, 2, th + 2, W + 2, C), jnp.bfloat16),
        ],
        compiler_params=pltpu.CompilerParams(
            dimension_semantics=("parallel", "parallel"),
            vmem_limit_bytes=_VMEM_LIMIT),
    )(x, x, x, wup, bup, wc2, bc2, wc3, bc3)
    # (2,2,N,H,W*C2) -> (N, C2, 2H, 2W): the 2x2 sub-pixel de-interleave and the
    # NHWC->NCHW conversion are folded into ONE transpose of the smallest tensor.
    out = out.reshape(2, 2, N, H, W, C2)
    out = jnp.transpose(out, (2, 5, 3, 0, 4, 1))   # (N, C2, H, 2, W, 2)
    return out.reshape(N, C2, 2 * H, 2 * W)


# --------------------------------------------------------------------- forward

def proto_forward(x_nchw, params):
    """Proto.forward. Input/output are NCHW (PyTorch convention)."""
    x = jnp.transpose(x_nchw, (0, 2, 3, 1))      # NCHW -> NHWC (entry glue)
    th = _pick_row_tile(x.shape[1])
    x = conv3x3_bn_silu(x, params["cv1_w"], params["cv1_b"], th)          # cv1
    return upsample_cv2_cv3(x, params["up_w"], params["up_b"],            # up+cv2+cv3
                            params["cv2_w"], params["cv2_b"],
                            params["cv3_w"], params["cv3_b"], th)


# ----------------------------------------------------------------------- params

def _fold_bn(key, c, eps=1e-5):
    """Deterministic BatchNorm2d params folded to (scale, bias)."""
    k1, k2, k3, k4 = jax.random.split(key, 4)
    gamma = 1.0 + 0.1 * jax.random.normal(k1, (c,), jnp.float32)
    beta = 0.1 * jax.random.normal(k2, (c,), jnp.float32)
    mean = 0.1 * jax.random.normal(k3, (c,), jnp.float32)
    var = 0.5 + jax.random.uniform(k4, (c,), jnp.float32)
    scale = gamma * jax.lax.rsqrt(var + eps)
    bias = beta - mean * scale
    return scale, bias


def make_params(key, c1, c_, c2):
    ks = jax.random.split(key, 8)
    w1 = 0.1 * jax.random.normal(ks[0], (3, 3, c1, c_), jnp.float32)
    s1, b1 = _fold_bn(ks[1], c_)
    wup = 0.1 * jax.random.normal(ks[2], (4, c_, c_), jnp.float32)   # idx = a*2+b, (Cin,Cout)
    bup = 0.05 * jax.random.normal(ks[3], (1, c_), jnp.float32)
    w2 = 0.1 * jax.random.normal(ks[4], (3, 3, c_, c_), jnp.float32)
    s2, b2 = _fold_bn(ks[5], c_)
    w3 = 0.1 * jax.random.normal(ks[6], (c_, c2), jnp.float32)
    s3, b3 = _fold_bn(ks[7], c2)
    return {
        # BN scale folded into conv weights; weights pre-cast to bf16 (MXU operands).
        "cv1_w": (w1 * s1[None, None, None, :]).reshape(9 * c1, c_).astype(jnp.bfloat16),
        "cv1_b": b1[None, :],
        "up_w": wup.astype(jnp.bfloat16),
        "up_b": bup,
        "cv2_w": (w2 * s2[None, None, None, :]).reshape(9 * c_, c_).astype(jnp.bfloat16),
        "cv2_b": b2[None, :],
        "cv3_w": (w3 * s3[None, :]).astype(jnp.bfloat16),
        "cv3_b": b3[None, :],
    }


# -------------------------------------------------------------------- reference

def proto_reference(x_nchw, params, c1, c_, c2):
    """Pure-JAX reference using the same folded weights (f32 math)."""
    w1 = params["cv1_w"].astype(jnp.float32).reshape(3, 3, c1, c_)
    w2 = params["cv2_w"].astype(jnp.float32).reshape(3, 3, c_, c_)
    wup = params["up_w"].astype(jnp.float32)
    w3 = params["cv3_w"].astype(jnp.float32)
    b1, b2 = params["cv1_b"][0], params["cv2_b"][0]
    bup, b3 = params["up_b"][0], params["cv3_b"][0]

    def conv3(x, w, b):
        H, W = x.shape[1], x.shape[2]
        xp = jnp.pad(x, ((0, 0), (1, 1), (1, 1), (0, 0)))
        y = b
        for ky in range(3):
            for kx in range(3):
                y = y + jnp.einsum("nhwc,cd->nhwd",
                                   xp[:, ky:ky + H, kx:kx + W, :], w[ky, kx])
        return y * jax.nn.sigmoid(y)

    x = jnp.transpose(x_nchw, (0, 2, 3, 1))
    x = conv3(x, w1, b1)
    N, H, W, C = x.shape
    u = jnp.stack([jnp.einsum("nhwc,cd->nhwd", x, wup[i]) + bup for i in range(4)], axis=3)
    u = u.reshape(N, H, W, 2, 2, C)
    u = jnp.transpose(u, (0, 1, 3, 2, 4, 5)).reshape(N, 2 * H, 2 * W, C)
    x = conv3(u, w2, b2)
    x = jnp.einsum("nhwc,cd->nhwd", x, w3) + b3
    x = x * jax.nn.sigmoid(x)
    return jnp.transpose(x, (0, 3, 1, 2))


# ------------------------------------------------------------------------- main

if __name__ == "__main__":
    key = jax.random.PRNGKey(0)
    k_x, k_p = jax.random.split(key)

    N, c1, H, W = 2, 8, 16, 16     # small NCHW input (2 row-tiles -> halo path exercised)
    c_, c2 = 32, 16                # Proto hidden / mask channels (scaled down)

    x = jax.random.normal(k_x, (N, c1, H, W), jnp.float32)
    params = make_params(k_p, c1, c_, c2)

    out = jax.block_until_ready(proto_forward(x, params))

    assert out.shape == (N, c2, 2 * H, 2 * W), out.shape
    assert out.dtype == jnp.float32
    assert bool(jnp.all(jnp.isfinite(out)))

    ref = jax.block_until_ready(proto_reference(x, params, c1, c_, c2))
    assert bool(jnp.allclose(out, ref, atol=3e-2, rtol=5e-2)), \
        float(jnp.max(jnp.abs(out - ref)))

    print("KERNEL_OK")
</pallas_src>

<mosaic_0001>
module attributes {stable_mosaic.version = 11 : i64} {
  func.func @_cv1_kernel(%arg0: i32, %arg1: i32, %arg2: memref<1x8x16x8xf32, #tpu.memory_space<vmem>>, %arg3: memref<1x1x16x8xf32, #tpu.memory_space<vmem>>, %arg4: memref<1x1x16x8xf32, #tpu.memory_space<vmem>>, %arg5: memref<72x32xbf16, #tpu.memory_space<vmem>>, %arg6: memref<1x32xf32, #tpu.memory_space<vmem>>, %arg7: memref<1x8x16x32xbf16, #tpu.memory_space<vmem>>, %arg8: memref<10x18x8xbf16, #tpu.memory_space<vmem>>) attributes {dimension_semantics = [#tpu.dimension_semantics<parallel>, #tpu.dimension_semantics<parallel>], iteration_bounds = array<i64: 2, 2>, scalar_prefetch = 0 : i64, scratch_operands = 1 : i64, tpu.core_type = #tpu.core_type<tc>, window_params = [{transform_indices = @transform_0, window_bounds = array<i64: 1, 8, 16, 8>}, {transform_indices = @transform_1, window_bounds = array<i64: 1, 1, 16, 8>}, {transform_indices = @transform_2, window_bounds = array<i64: 1, 1, 16, 8>}, {pipeline_mode = #tpu.pipeline_mode<synchronous>, transform_indices = @transform_3, window_bounds = array<i64: 72, 32>}, {pipeline_mode = #tpu.pipeline_mode<synchronous>, transform_indices = @transform_4, window_bounds = array<i64: 1, 32>}, {transform_indices = @transform_5, window_bounds = array<i64: 1, 8, 16, 32>}]} {
    %cst = arith.constant 0.000000e+00 : bf16
    %0 = vector.broadcast %cst : bf16 to vector<10x1x8xbf16>
    %c0 = arith.constant 0 : index
    %c0_0 = arith.constant 0 : index
    %c0_1 = arith.constant 0 : index
    %1 = vector.load %arg8[%c0, %c0_0, %c0_1] : memref<10x18x8xbf16, #tpu.memory_space<vmem>>, vector<10x1x8xbf16>
    tpu.vector_store %arg8[%c0, %c0_0, %c0_1], %0 {strides = array<i32>} : memref<10x18x8xbf16, #tpu.memory_space<vmem>>, vector<10x1x8xbf16>,
    %cst_2 = arith.constant 0.000000e+00 : bf16
    %2 = vector.broadcast %cst_2 : bf16 to vector<10x1x8xbf16>
    %c0_3 = arith.constant 0 : index
    %c17 = arith.constant 17 : index
    %c0_4 = arith.constant 0 : index
    %3 = vector.load %arg8[%c0_3, %c17, %c0_4] : memref<10x18x8xbf16, #tpu.memory_space<vmem>>, vector<10x1x8xbf16>
    tpu.vector_store %arg8[%c0_3, %c17, %c0_4], %2 {strides = array<i32>} : memref<10x18x8xbf16, #tpu.memory_space<vmem>>, vector<10x1x8xbf16>,
    %c0_5 = arith.constant 0 : index
    %c0_6 = arith.constant 0 : index
    %c0_7 = arith.constant 0 : index
    %c0_8 = arith.constant 0 : index
    %4 = vector.load %arg2[%c0_5, %c0_6, %c0_7, %c0_8] : memref<1x8x16x8xf32, #tpu.memory_space<vmem>>, vector<1x8x16x8xf32>
    %5 = vector.shape_cast %4 : vector<1x8x16x8xf32> to vector<8x16x8xf32>
    %6 = arith.truncf %5 : vector<8x16x8xf32> to vector<8x16x8xbf16>
    %c1 = arith.constant 1 : index
    %c1_9 = arith.constant 1 : index
    %c0_10 = arith.constant 0 : index
    %7 = vector.load %arg8[%c1, %c1_9, %c0_10] : memref<10x18x8xbf16, #tpu.memory_space<vmem>>, vector<8x16x8xbf16>
    tpu.vector_store %arg8[%c1, %c1_9, %c0_10], %6 {strides = array<i32>} : memref<10x18x8xbf16, #tpu.memory_space<vmem>>, vector<8x16x8xbf16>,
    %c0_i32 = arith.constant 0 : i32
    %8 = arith.cmpi sgt, %arg1, %c0_i32 : i32
    %9 = arith.extui %8 : i1 to i32
    %c0_i32_11 = arith.constant 0 : i32
    %10 = arith.cmpi ne, %9, %c0_i32_11 : i32
    scf.if %10 {
      %c0_53 = arith.constant 0 : index
      %c0_54 = arith.constant 0 : index
      %c0_55 = arith.constant 0 : index
      %c0_56 = arith.constant 0 : index
      %57 = vector.load %arg3[%c0_53, %c0_54, %c0_55, %c0_56] : memref<1x1x16x8xf32, #tpu.memory_space<vmem>>, vector<1x1x16x8xf32>
      %58 = vector.shape_cast %57 : vector<1x1x16x8xf32> to vector<1x16x8xf32>
      %59 = arith.truncf %58 : vector<1x16x8xf32> to vector<1x16x8xbf16>
      %c0_57 = arith.constant 0 : index
      %c1_58 = arith.constant 1 : index
      %c0_59 = arith.constant 0 : index
      %60 = vector.load %arg8[%c0_57, %c1_58, %c0_59] : memref<10x18x8xbf16, #tpu.memory_space<vmem>>, vector<1x16x8xbf16>
      tpu.vector_store %arg8[%c0_57, %c1_58, %c0_59], %59 {strides = array<i32>} : memref<10x18x8xbf16, #tpu.memory_space<vmem>>, vector<1x16x8xbf16>,
    } else {
    }
    %c0_i32_12 = arith.constant 0 : i32
    %11 = arith.cmpi eq, %arg1, %c0_i32_12 : i32
    %12 = arith.extui %11 : i1 to i32
    %c0_i32_13 = arith.constant 0 : i32
    %13 = arith.cmpi ne, %12, %c0_i32_13 : i32
    scf.if %13 {
      %cst_53 = arith.constant 0.000000e+00 : bf16
      %57 = vector.broadcast %cst_53 : bf16 to vector<1x16x8xbf16>
      %c0_54 = arith.constant 0 : index
      %c1_55 = arith.constant 1 : index
      %c0_56 = arith.constant 0 : index
      %58 = vector.load %arg8[%c0_54, %c1_55, %c0_56] : memref<10x18x8xbf16, #tpu.memory_space<vmem>>, vector<1x16x8xbf16>
      tpu.vector_store %arg8[%c0_54, %c1_55, %c0_56], %57 {strides = array<i32>} : memref<10x18x8xbf16, #tpu.memory_space<vmem>>, vector<1x16x8xbf16>,
    } else {
    }
    %c1_i32 = arith.constant 1 : i32
    %14 = arith.cmpi slt, %arg1, %c1_i32 : i32
    %15 = arith.extui %14 : i1 to i32
    %c0_i32_14 = arith.constant 0 : i32
    %16 = arith.cmpi ne, %15, %c0_i32_14 : i32
    scf.if %16 {
      %c0_53 = arith.constant 0 : index
      %c0_54 = arith.constant 0 : index
      %c0_55 = arith.constant 0 : index
      %c0_56 = arith.constant 0 : index
      %57 = vector.load %arg4[%c0_53, %c0_54, %c0_55, %c0_56] : memref<1x1x16x8xf32, #tpu.memory_space<vmem>>, vector<1x1x16x8xf32>
      %58 = vector.shape_cast %57 : vector<1x1x16x8xf32> to vector<1x16x8xf32>
      %59 = arith.truncf %58 : vector<1x16x8xf32> to vector<1x16x8xbf16>
      %c9 = arith.constant 9 : index
      %c1_57 = arith.constant 1 : index
      %c0_58 = arith.constant 0 : index
      %60 = vector.load %arg8[%c9, %c1_57, %c0_58] : memref<10x18x8xbf16, #tpu.memory_space<vmem>>, vector<1x16x8xbf16>
      tpu.vector_store %arg8[%c9, %c1_57, %c0_58], %59 {strides = array<i32>} : memref<10x18x8xbf16, #tpu.memory_space<vmem>>, vector<1x16x8xbf16>,
    } else {
    }
    %c1_i32_15 = arith.constant 1 : i32
    %17 = arith.cmpi eq, %arg1, %c1_i32_15 : i32
    %18 = arith.extui %17 : i1 to i32
    %c0_i32_16 = arith.constant 0 : i32
    %19 = arith.cmpi ne, %18, %c0_i32_16 : i32
    scf.if %19 {
      %cst_53 = arith.constant 0.000000e+00 : bf16
      %57 = vector.broadcast %cst_53 : bf16 to vector<1x16x8xbf16>
      %c9 = arith.constant 9 : index
      %c1_54 = arith.constant 1 : index
      %c0_55 = arith.constant 0 : index
      %58 = vector.load %arg8[%c9, %c1_54, %c0_55] : memref<10x18x8xbf16, #tpu.memory_space<vmem>>, vector<1x16x8xbf16>
      tpu.vector_store %arg8[%c9, %c1_54, %c0_55], %57 {strides = array<i32>} : memref<10x18x8xbf16, #tpu.memory_space<vmem>>, vector<1x16x8xbf16>,
    } else {
    }
    %c0_17 = arith.constant 0 : index
    %c0_18 = arith.constant 0 : index
    %c0_19 = arith.constant 0 : index
    %20 = vector.load %arg8[%c0_17, %c0_18, %c0_19] : memref<10x18x8xbf16, #tpu.memory_space<vmem>>, vector<8x16x8xbf16>
    %21 = vector.shape_cast %20 : vector<8x16x8xbf16> to vector<128x8xbf16>
    %c0_20 = arith.constant 0 : index
    %c1_21 = arith.constant 1 : index
    %c0_22 = arith.constant 0 : index
    %22 = vector.load %arg8[%c0_20, %c1_21, %c0_22] : memref<10x18x8xbf16, #tpu.memory_space<vmem>>, vector<8x16x8xbf16>
    %23 = vector.shape_cast %22 : vector<8x16x8xbf16> to vector<128x8xbf16>
    %c0_23 = arith.constant 0 : index
    %c2 = arith.constant 2 : index
    %c0_24 = arith.constant 0 : index
    %24 = vector.load %arg8[%c0_23, %c2, %c0_24] : memref<10x18x8xbf16, #tpu.memory_space<vmem>>, vector<8x16x8xbf16>
    %25 = vector.shape_cast %24 : vector<8x16x8xbf16> to vector<128x8xbf16>
    %c1_25 = arith.constant 1 : index
    %c0_26 = arith.constant 0 : index
    %c0_27 = arith.constant 0 : index
    %26 = vector.load %arg8[%c1_25, %c0_26, %c0_27] : memref<10x18x8xbf16, #tpu.memory_space<vmem>>, vector<8x16x8xbf16>
    %27 = vector.shape_cast %26 : vector<8x16x8xbf16> to vector<128x8xbf16>
    %c1_28 = arith.constant 1 : index
    %c1_29 = arith.constant 1 : index
    %c0_30 = arith.constant 0 : index
    %28 = vector.load %arg8[%c1_28, %c1_29, %c0_30] : memref<10x18x8xbf16, #tpu.memory_space<vmem>>, vector<8x16x8xbf16>
    %29 = vector.shape_cast %28 : vector<8x16x8xbf16> to vector<128x8xbf16>
    %c1_31 = arith.constant 1 : index
    %c2_32 = arith.constant 2 : index
    %c0_33 = arith.constant 0 : index
    %30 = vector.load %arg8[%c1_31, %c2_32, %c0_33] : memref<10x18x8xbf16, #tpu.memory_space<vmem>>, vector<8x16x8xbf16>
    %31 = vector.shape_cast %30 : vector<8x16x8xbf16> to vector<128x8xbf16>
    %c2_34 = arith.constant 2 : index
    %c0_35 = arith.constant 0 : index
    %c0_36 = arith.constant 0 : index
    %32 = vector.load %arg8[%c2_34, %c0_35, %c0_36] : memref<10x18x8xbf16, #tpu.memory_space<vmem>>, vector<8x16x8xbf16>
    %33 = vector.shape_cast %32 : vector<8x16x8xbf16> to vector<128x8xbf16>
    %c2_37 = arith.constant 2 : index
    %c1_38 = arith.constant 1 : index
    %c0_39 = arith.constant 0 : index
    %34 = vector.load %arg8[%c2_37, %c1_38, %c0_39] : memref<10x18x8xbf16, #tpu.memory_space<vmem>>, vector<8x16x8xbf16>
    %35 = vector.shape_cast %34 : vector<8x16x8xbf16> to vector<128x8xbf16>
    %c2_40 = arith.constant 2 : index
    %c2_41 = arith.constant 2 : index
    %c0_42 = arith.constant 0 : index
    %36 = vector.load %arg8[%c2_40, %c2_41, %c0_42] : memref<10x18x8xbf16, #tpu.memory_space<vmem>>, vector<8x16x8xbf16>
    %37 = vector.shape_cast %36 : vector<8x16x8xbf16> to vector<128x8xbf16>
    %38 = tpu.concatenate %21, %23, %25, %27, %29, %31, %33, %35, %37 in 1 : vector<128x8xbf16>, vector<128x8xbf16>, vector<128x8xbf16>, vector<128x8xbf16>, vector<128x8xbf16>, vector<128x8xbf16>, vector<128x8xbf16>, vector<128x8xbf16>, vector<128x8xbf16> -> vector<128x72xbf16>
    %c0_43 = arith.constant 0 : index
    %c0_44 = arith.constant 0 : index
    %39 = vector.load %arg5[%c0_43, %c0_44] : memref<72x32xbf16, #tpu.memory_space<vmem>>, vector<72x32xbf16>
    %cst_45 = arith.constant dense<0.000000e+00> : vector<128x32xf32>
    %40 = tpu.matmul %38, %39, %cst_45 {dimension_numbers = #tpu.dot_dimension_numbers<[1], [0], [0], [1], [0, 0, 1, 1], [], []>} : vector<128x72xbf16>, vector<72x32xbf16>, vector<128x32xf32> -> vector<128x32xf32>
    %c0_46 = arith.constant 0 : index
    %c0_47 = arith.constant 0 : index
    %41 = vector.load %arg6[%c0_46, %c0_47] : memref<1x32xf32, #tpu.memory_space<vmem>>, vector<1x32xf32>
    %42 = vector.shape_cast %41 : vector<1x32xf32> to vector<32xf32>
    %43 = vector.shape_cast %42 : vector<32xf32> to vector<1x32xf32>
    %44 = vector.broadcast %43 : vector<1x32xf32> to vector<128x32xf32>
    %45 = arith.addf %40, %44 : vector<128x32xf32>
    %46 = arith.negf %45 : vector<128x32xf32>
    %47 = math.exp %46 : vector<128x32xf32>
    %cst_48 = arith.constant 1.000000e+00 : f32
    %48 = vector.broadcast %cst_48 : f32 to vector<128x32xf32>
    %49 = arith.addf %48, %47 : vector<128x32xf32>
    %50 = arith.divf %48, %49 : vector<128x32xf32>
    %51 = arith.mulf %45, %50 : vector<128x32xf32>
    %52 = vector.shape_cast %51 : vector<128x32xf32> to vector<8x16x32xf32>
    %53 = arith.truncf %52 : vector<8x16x32xf32> to vector<8x16x32xbf16>
    %c0_49 = arith.constant 0 : index
    %c0_50 = arith.constant 0 : index
    %c0_51 = arith.constant 0 : index
    %c0_52 = arith.constant 0 : index
    %54 = vector.load %arg7[%c0_49, %c0_50, %c0_51, %c0_52] : memref<1x8x16x32xbf16, #tpu.memory_space<vmem>>, vector<1x8x16x32xbf16>
    %55 = vector.shape_cast %54 : vector<1x8x16x32xbf16> to vector<8x16x32xbf16>
    %56 = vector.shape_cast %53 : vector<8x16x32xbf16> to vector<1x8x16x32xbf16>
    tpu.vector_store %arg7[%c0_49, %c0_50, %c0_51, %c0_52], %56 {strides = array<i32>} : memref<1x8x16x32xbf16, #tpu.memory_space<vmem>>, vector<1x8x16x32xbf16>,
    return
  }
  func.func @transform_0(%arg0: i32, %arg1: i32) -> (i32, i32, i32, i32) {
    %c0_i32 = arith.constant 0 : i32
    %c0_i32_0 = arith.constant 0 : i32
    %c0_i32_1 = arith.constant 0 : i32
    return %arg0, %arg1, %c0_i32, %c0_i32_0 : i32, i32, i32, i32
  }
  func.func @transform_1(%arg0: i32, %arg1: i32) -> (i32, i32, i32, i32) {
    %c8_i32 = arith.constant 8 : i32
    %0 = arith.muli %arg1, %c8_i32 : i32
    %c1_i32 = arith.constant 1 : i32
    %1 = arith.subi %0, %c1_i32 : i32
    %c0_i32 = arith.constant 0 : i32
    %2 = arith.maxsi %1, %c0_i32 : i32
    %c0_i32_0 = arith.constant 0 : i32
    %c0_i32_1 = arith.constant 0 : i32
    %c0_i32_2 = arith.constant 0 : i32
    return %arg0, %2, %c0_i32_0, %c0_i32_1 : i32, i32, i32, i32
  }
  func.func @transform_2(%arg0: i32, %arg1: i32) -> (i32, i32, i32, i32) {
    %c8_i32 = arith.constant 8 : i32
    %0 = arith.muli %arg1, %c8_i32 : i32
    %c8_i32_0 = arith.constant 8 : i32
    %1 = arith.addi %0, %c8_i32_0 : i32
    %c15_i32 = arith.constant 15 : i32
    %2 = arith.minsi %1, %c15_i32 : i32
    %c0_i32 = arith.constant 0 : i32
    %c0_i32_1 = arith.constant 0 : i32
    %c0_i32_2 = arith.constant 0 : i32
    return %arg0, %2, %c0_i32, %c0_i32_1 : i32, i32, i32, i32
  }
  func.func @transform_3(%arg0: i32, %arg1: i32) -> (i32, i32) {
    %c0_i32 = arith.constant 0 : i32
    %c0_i32_0 = arith.constant 0 : i32
    %c0_i32_1 = arith.constant 0 : i32
    return %c0_i32, %c0_i32_0 : i32, i32
  }
  func.func @transform_4(%arg0: i32, %arg1: i32) -> (i32, i32) {
    %c0_i32 = arith.constant 0 : i32
    %c0_i32_0 = arith.constant 0 : i32
    %c0_i32_1 = arith.constant 0 : i32
    return %c0_i32, %c0_i32_0 : i32, i32
  }
  func.func @transform_5(%arg0: i32, %arg1: i32) -> (i32, i32, i32, i32) {
    %c0_i32 = arith.constant 0 : i32
    %c0_i32_0 = arith.constant 0 : i32
    %c0_i32_1 = arith.constant 0 : i32
    return %arg0, %arg1, %c0_i32, %c0_i32_0 : i32, i32, i32, i32
  }
}

</mosaic_0001>

<bundles_post_ra>
// kernel: tpu_custom_call.1
= control target key start
LH: loop header
LB: loop body
LE: loop exit
PB: predicated region body
PF: predicated region fallthrough
CT: control target
= control target key end

     0   :  { %10 = vsyncpa [#allocation4], 0  ;;  %s4387_s0 = inlined_call_operand.vmem [shape: f32[2,16,16,8], index: 0, kind: input, shape index: {}]   ;;  %s4388_s1 = inlined_call_operand.vmem [shape: f32[2,16,16,8], index: 1, kind: input, shape index: {}]   ;;  %s4389_s2 = inlined_call_operand.vmem [shape: f32[2,16,16,8], index: 2, kind: input, shape index: {}]   ;;  %s4390_s3 = inlined_call_operand.vmem [shape: bf16[72,32], index: 3, kind: input, shape index: {}]   ;;  %s4391_s4 = inlined_call_operand.vmem [shape: f32[1,32], index: 4, kind: input, shape index: {}]   ;;  %s4392_s5 = inlined_call_operand.hbm [shape: bf16[2,16,16,32], index: 5, kind: output, shape index: {}]  }
   0x1   :  { %12 = vsyncpa [#allocation4 + $0x1], 0  ;;  %s3369_s18 = smov 0   ;;  %s3371_s19 = smov 0  }
   0x2   :  { %s3373_s20 = smov 0   ;;  %s3375_s21 = smov 0  }
   0x3   :  { %s3377_s22 = smov 0   ;;  %s3379_s23 = smov 0  }
   0x4   :  { %s3381_s24 = smov 0   ;;  %s3383_s25 = smov 0  }
   0x5 LB: > { %s2835_s26 = sadd.s32 4294967295, %s3326_s25   ;;  %s2836_s27 = sadd.s32 4294967294, %s3326_s25   ;;  %s3326_s25 = sphi %s3383_s25, %s18_s25   ;;  %s3322_s24 = sphi %s3381_s24, %s4414_s24   ;;  %s3318_s23 = sphi %s3379_s23, %s4413_s23   ;;  %s3314_s22 = sphi %s3377_s22, %s4412_s22   ;;  %s3310_s21 = sphi %s3375_s21, %s4411_s21   ;;  %s3306_s20 = sphi %s3373_s20, %s4410_s20   ;;  %s3302_s19 = sphi %s3371_s19, %s4409_s19   ;;  %s3298_s18 = sphi %s3369_s18, %s4408_s18  }
   0x6   : > { %s27_s28 = sadd.s32 1, %s3318_s23  ;;  %s30_s29 = sadd.s32 1, %s3322_s24 }
   0x7   : > { %p28_p0 = scmp.ge.s32.totalorder %s27_s28, 2  ;;  %p191_p1 = scmp.ne.s32.totalorder %s3306_s20, %s3302_s19 }
   0x8   : > { %p192_p2 = scmp.eq.s32.totalorder %s2835_s26, 3  ;;  %p197_p5 = scmp.ne.s32.totalorder %s3302_s19, %s3298_s18 }
   0x9   : > { %s4416_s28 = smov (%p28_p0, %s27_s28), 0  ;;  %s4418_s29 = smov (!%p28_p0, %s30_s29), %s3322_s24 }
   0xa   : > { %s177_s30 = ssub.s32 %s3318_s23, %s4416_s28  ;;  %p3420_p3 = por %p192_p2, %p191_p1 }
   0xb   : > { %p32_p4 = scmp.ge.s32.totalorder %s4418_s29, 2  ;;  %p198_p6 = scmp.eq.s32.totalorder %s2836_s27, 3 }
   0xc   : > { %p2845_p7 = scmp.ge.s32.totalorder %s3326_s25, 1  ;;  %p276_p9 = scmp.lt.s32.totalorder %s3326_s25, 5 }
   0xd   : > { %s4420_s29 = smov (%p32_p4, %s4418_s29), 0  ;;  %p3429_p8 = por %p198_p6, %p197_p5 }
   0xe   : > { %s176_s8 = ssub.s32 %s3322_s24, %s4420_s29  ;;  %s181_s9 = sadd.s32 1, %s3306_s20 }
   0xf   : > { %s178_s10 = sor.u32 %s177_s30, %s176_s8  ;;  %p277_p10 = pnand %p2845_p7, %p276_p9 }
  0x10   : > { %p179_p11 = scmp.eq.s32.totalorder %s178_s10, 0  ;;  %s332_s12 = sand.u32 (!%p277_p10), 1, %s3302_s19  }
  0x11   : > { %280 = sbr.rel (%p277_p10) target bundleno = 605 (0x25d), region = 40  ;;  %s3455_s13 = sshll.u32 (!%p277_p10), %s332_s12, 6 }
  0x12   : > { %s3438_s11 = scalar_select %p179_p11, %s3306_s20, %s181_s9  }
  0x13   : > { %s3462_s14 = sshll.u32 (!%p277_p10), %s3310_s21, 3  ;;  %p336_p12 = scmp.lt.s32.totalorder (!%p277_p10), %s3314_s22, 1 }
  0x14   : > { %p338_p13 = scmp.lt.s32.totalorder (!%p277_p10), %s3462_s14, 15  ;;  %s2852_s30 = sadd.s32 (!%p277_p10), 4294967295, %s3462_s14 }
  0x15   : > { %p348_p0 = scmp.gt.s32.totalorder (!%p277_p10), %s2852_s30, 0  ;;  %p2853_p1 = scmp.lt.s32.totalorder (!%p277_p10), %s2852_s30, 15 }
  0x16   : > { %vm382_vm0 = vcmask 57344   ;;  %vm383_vm1 = vsmask.f32 256  ;;  %v388_v0 = vld [vmem:[#allocation2 + $0xc] sm:$0x1]  ;;  %s337_s15 = scalar_select %p336_p12, %s3314_s22, 1 }
  0x17   : > { %vm3443_vm2 = vmand %vm382_vm0, %vm383_vm1  ;;  %v391_v2 = vld [vmem:[#allocation2 + $0x18] sm:$0x1]  ;;  %v394_v3 = vld [vmem:[#allocation2 + $0x24] sm:$0x1]  ;;  %vm415_vm3 = vsmask.f32 7938 }
  0x18   : > { %v389_v4 = vsel %vm3443_vm2, 0, %v388_v0  ;;  %v392_v5 = vsel %vm3443_vm2, 0, %v391_v2  ;;  %v395_v6 = vsel %vm3443_vm2, 0, %v394_v3  ;;  %v397_v7 = vld [vmem:[#allocation2 + $0x30] sm:$0x1]  ;;  %vm3468_vm4 = vmand %vm382_vm0, %vm415_vm3  ;;  %s339_s16 = scalar_select %p338_p13, %s3462_s14, 15 }
  0x19   : > { %390 = vst [vmem:[#allocation2 + $0xc] sm:$0x1] %v389_v4  ;;  %v398_v8 = vsel %vm3443_vm2, 0, %v397_v7  ;;  %v400_v9 = vld [vmem:[#allocation2 + $0x3c] sm:$0x1]  ;;  %s3484_s17 = sshll.u32 %s337_s15, 5 }
  0x1a   : > { %393 = vst [vmem:[#allocation2 + $0x18] sm:$0x1] %v392_v5  ;;  %v401_v10 = vsel %vm3443_vm2, 0, %v400_v9  ;;  %v403_v11 = vld [vmem:[#allocation2 + $0x48] sm:$0x1]  ;;  %s2848_s26 = sshll.u32 %s339_s16, 1 }
  0x1b   : > { %396 = vst [vmem:[#allocation2 + $0x24] sm:$0x1] %v395_v6  ;;  %v404_v12 = vsel %vm3443_vm2, 0, %v403_v11  ;;  %v406_v13 = vld [vmem:[#allocation2 + $0x54] sm:$0x1]  ;;  %s342_s27 = sadd.s32 %s3484_s17, %s2848_s26  ;;  %s4422_s30 = smov (!%p348_p0, %s2852_s30), 0 }
  0x1c   : > { %399 = vst [vmem:[#allocation2 + $0x30] sm:$0x1] %v398_v8  ;;  %v407_v15 = vsel %vm3443_vm2, 0, %v406_v13  ;;  %v409_v16 = vld [vmem:[#allocation2 + $0x60] sm:$0x1]  ;;  %s2850_s8 = sshll.u32 %s342_s27, 3 }
  0x1d   : > { %402 = vst [vmem:[#allocation2 + $0x3c] sm:$0x1] %v401_v10  ;;  %v410_v17 = vsel %vm3443_vm2, 0, %v409_v16  ;;  %v420_v18 = vld [vmem:[#allocation2 + $0x14] sm:$0x1]  ;;  %s3505_s15 = scalar_lea.vmem %s4387_s0, %s2850_s8  ;;  %s364_s16 = sadd.s32 8, %s3462_s14 }
  0x1e   : > { %405 = vst [vmem:[#allocation2 + $0x48] sm:$0x1] %v404_v12  ;;  %v421_v19 = vsel %vm3468_vm4, 0, %v420_v18  ;;  %v423_v20 = vld [vmem:[#allocation2 + $0x20] sm:$0x1]  ;;  %s4424_s30 = smov (!%p2853_p1, %s4422_s30), 15 }
  0x1f   : > { %408 = vst [vmem:[#allocation2 + $0x54] sm:$0x1] %v407_v15  ;;  %v424_v21 = vsel %vm3468_vm4, 0, %v423_v20  ;;  %v426_v22 = vld [vmem:[#allocation2 + $0x2c] sm:$0x1]  ;;  %s2858_s26 = sshll.u32 %s4424_s30, 1 }
  0x20   : > { %411 = vst [vmem:[#allocation2 + $0x60] sm:$0x1] %v410_v17  ;;  %v427_v23 = vsel %vm3468_vm4, 0, %v426_v22  ;;  %v429_v24 = vld [vmem:[#allocation2 + $0x38] sm:$0x1]  ;;  %p3514_p2 = scmp.lt.s32.totalorder %s364_s16, 15  ;;  %s356_s27 = sadd.s32 %s2858_s26, %s3484_s17 }
  0x21   : > { %422 = vst [vmem:[#allocation2 + $0x14] sm:$0x1] %v421_v19  ;;  %v430_v25 = vsel %vm3468_vm4, 0, %v429_v24  ;;  %v432_v26 = vld [vmem:[#allocation2 + $0x44] sm:$0x1]  ;;  %v448_v44 = vld [vmem:[%s3505_s15 + $0x8] sm:$0xff] }
  0x22   : > { %425 = vst [vmem:[#allocation2 + $0x20] sm:$0x1] %v424_v21  ;;  %v433_v27 = vsel %vm3468_vm4, 0, %v432_v26  ;;  %v435_v28 = vld [vmem:[#allocation2 + $0x50] sm:$0x1]  ;;  %v447_v42 = vld [vmem:[%s3505_s15] sm:$0xff]  ;;  %v464_v45 = vpack.c.bf16 %v448_v44, %v448_v44 }
  0x23   : > { %428 = vst [vmem:[#allocation2 + $0x2c] sm:$0x1] %v427_v23  ;;  %v436_v29 = vsel %vm3468_vm4, 0, %v435_v28  ;;  %v438_v30 = vld [vmem:[#allocation2 + $0x5c] sm:$0x1]  ;;  %v463_v43 = vpack.c.bf16 %v447_v42, %v447_v42  ;;  %s2860_s8 = sshll.u32 %s356_s27, 3 }
  0x24   : > { %431 = vst [vmem:[#allocation2 + $0x38] sm:$0x1] %v430_v25  ;;  %v439_v31 = vsel %vm3468_vm4, 0, %v438_v30  ;;  %v441_v32 = vld [vmem:[#allocation2 + $0x68] sm:$0x1]  ;;  %v449_v46 = vld [vmem:[%s3505_s15 + $0x10] sm:$0xff]  ;;  %s3525_s30 = scalar_lea.vmem %s4388_s1, %s2860_s8 }
  0x25   : > { %434 = vst [vmem:[#allocation2 + $0x44] sm:$0x1] %v433_v27  ;;  %v442_v33 = vsel %vm3468_vm4, 0, %v441_v32  ;;  %v385_v34 = vld [vmem:[#allocation2] sm:$0x1]  ;;  %v482_v47 = vshrl.u32 %v463_v43, 16  ;;  %v465_v49 = vpack.c.bf16 %v449_v46, %v449_v46 }
  0x26   : > { %437 = vst [vmem:[#allocation2 + $0x50] sm:$0x1] %v436_v29  ;;  %v386_v35 = vsel %vm3443_vm2, 0, %v385_v34  ;;  %v412_v36 = vld [vmem:[#allocation2 + $0x6c] sm:$0x1]  ;;  %v485_v48 = vshll.u32 %v463_v43, 16 }
  0x27   : > { %440 = vst [vmem:[#allocation2 + $0x5c] sm:$0x1] %v439_v31  ;;  %v413_v37 = vsel %vm3443_vm2, 0, %v412_v36  ;;  %v417_v38 = vld [vmem:[#allocation2 + $0x8] sm:$0x1]  ;;  %vm642_vm5 = vcmask 60416  }
  0x28   : > { %443 = vst [vmem:[#allocation2 + $0x68] sm:$0x1] %v442_v33  ;;  %v418_v39 = vsel %vm3468_vm4, 0, %v417_v38  ;;  %v444_v40 = vld [vmem:[#allocation2 + $0x74] sm:$0x1]  ;;  %s4426_s16 = smov (!%p3514_p2, %s364_s16), 15  ;;  %vm3535_vm7 = vmand %vm642_vm5, %vm415_vm3 }
  0x29   : > { %387 = vst [vmem:[#allocation2] sm:$0x1] %v386_v35  ;;  %v445_v41 = vsel %vm3468_vm4, 0, %v444_v40  ;;  %vm479_vm6 = vsmask.f32 4368  ;;  %v490_v50 = vshrl.u32 %v464_v45, 16 }
  0x2a   : > { %414 = vst [vmem:[#allocation2 + $0x6c] sm:$0x1] %v413_v37  ;;  %v493_v51 = vshll.u32 %v464_v45, 16  ;;  %v450_v52 = vld [vmem:[%s3505_s15 + $0x18] sm:$0xff]  ;;  %v484_v53 = vrot.slane %v482_v47, 7  ;;  %v499_v54 = vshrl.u32 %v465_v49, 16  ;;  %vm3541_vm8 = vmor %vm383_vm1, %vm479_vm6 }
  0x2b   : > { %419 = vst [vmem:[#allocation2 + $0x8] sm:$0x1] %v418_v39  ;;  %v502_v55 = vshll.u32 %v465_v49, 16  ;;  %v466_v56 = vpack.c.bf16 %v450_v52, %v450_v52  ;;  %v451_v57 = vld [vmem:[%s3505_s15 + $0x20] sm:$0xff]  ;;  %s4428_s16 = smov (!%p3514_p2, %s4426_s16), 15  ;;  %v492_v60 = vrot.slane %v490_v50, 7 }
  0x2c   : > { %446 = vst [vmem:[#allocation2 + $0x74] sm:$0x1] %v445_v41  ;;  %v644_v59 = vld [vmem:[#allocation2 + $0xc] sm:$0xf]  ;;  %v649_v61 = vld [vmem:[#allocation2 + $0x14] sm:$0x1]  ;;  %v467_v62 = vpack.c.bf16 %v451_v57, %v451_v57  ;;  %v487_v63 = vor.u32 %v485_v48, %v484_v53 }
  0x2d   : > { %v488_v2 = vrot.slane %v484_v53, 4  ;;  %v501_v3 = vrot.slane %v499_v54, 7  ;;  %v652_v4 = vld [vmem:[#allocation2 + $0x18] sm:$0xf]  ;;  %v507_v5 = vshrl.u32 %v466_v56, 16  ;;  %s2865_s26 = sshll.u32 %s4428_s16, 1  ;;  %v495_v6 = vor.u32 %v493_v51, %v492_v60 }
  0x2e   : > { %v497_v7 = vrot.slane %v492_v60, 4  ;;  %v510_v8 = vshll.u32 %v466_v56, 16  ;;  %v516_v9 = vshrl.u32 %v467_v62, 16  ;;  %v452_v10 = vld [vmem:[%s3505_s15 + $0x28] sm:$0xff]  ;;  %s373_s14 = sadd.s32 %s2865_s26, %s3484_s17  ;;  %v645_v11 = vsel %vm3535_vm7, %v487_v63, %v644_v59  ;;  %v656_v15 = vld [vmem:[#allocation2 + $0x20] sm:$0x1] }
  0x2f   : > { %v504_v12 = vor.u32 %v502_v55, %v501_v3  ;;  %v505_v13 = vrot.slane %v501_v3, 4  ;;  %v509_v14 = vrot.slane %v507_v5, 7  ;;  %v453_v16 = vld [vmem:[%s3505_s15 + $0x30] sm:$0xff]  ;;  %v454_v17 = vld [vmem:[%s3505_s15 + $0x38] sm:$0xff]  ;;  %s2867_s27 = sshll.u32 %s373_s14, 3  ;;  %v496_v18 = vsel %vm3541_vm8, %v488_v2, %v495_v6  ;;  %v455_v31 = vld [vmem:[%s3505_s15 + $0x40] sm:$0xff] }
  0x30   : > { %646 = vst [vmem:[#allocation2 + $0xc] sm:$0xf] %v645_v11  ;;  %v650_v19 = vsel %vm3443_vm2, %v497_v7, %v649_v61  ;;  %v518_v20 = vrot.slane %v516_v9, 7  ;;  %v519_v21 = vshll.u32 %v467_v62, 16  ;;  %s3558_s8 = scalar_lea.vmem %s4389_s2, %s2867_s27  ;;  %v659_v25 = vld [vmem:[#allocation2 + $0x24] sm:$0xf]  ;;  %v468_v26 = vpack.c.bf16 %v452_v10, %v452_v10 }
  0x31   : > { %648 = vst.msk [vmem:[#allocation2 + $0x10] sm:$0xf] %vm642_vm5, %v496_v18  ;;  %v653_v22 = vsel %vm3535_vm7, %v504_v12, %v652_v4  ;;  %v512_v23 = vor.u32 %v510_v8, %v509_v14  ;;  %v514_v24 = vrot.slane %v509_v14, 4  ;;  %v469_v29 = vpack.c.bf16 %v453_v16, %v453_v16  ;;  %v456_v32 = vld [vmem:[%s3505_s15 + $0x48] sm:$0xff]  ;;  %v457_v37 = vld [vmem:[%s3505_s15 + $0x50] sm:$0xff]  ;;  %v458_v38 = vld [vmem:[%s3505_s15 + $0x58] sm:$0xff] }
  0x32   : > { %651 = vst [vmem:[#allocation2 + $0x14] sm:$0x1] %v650_v19  ;;  %v521_v27 = vor.u32 %v519_v21, %v518_v20  ;;  %v522_v28 = vrot.slane %v518_v20, 4  ;;  %v470_v30 = vpack.c.bf16 %v454_v17, %v454_v17  ;;  %v524_v35 = vshrl.u32 %v468_v26, 16  ;;  %v663_v44 = vld [vmem:[#allocation2 + $0x2c] sm:$0x1] }
  0x33   : > { %654 = vst [vmem:[#allocation2 + $0x18] sm:$0xf] %v653_v22  ;;  %v513_v33 = vsel %vm3541_vm8, %v505_v13, %v512_v23  ;;  %v657_v34 = vsel %vm3443_vm2, %v514_v24, %v656_v15  ;;  %v527_v36 = vshll.u32 %v468_v26, 16  ;;  %v533_v40 = vshrl.u32 %v469_v29, 16  ;;  %v666_v49 = vld [vmem:[#allocation2 + $0x30] sm:$0xf] }
  0x34   : > { %655 = vst.msk [vmem:[#allocation2 + $0x1c] sm:$0xf] %vm642_vm5, %v513_v33  ;;  %v660_v39 = vsel %vm3535_vm7, %v521_v27, %v659_v25  ;;  %v536_v41 = vshll.u32 %v469_v29, 16  ;;  %v541_v42 = vshrl.u32 %v470_v30, 16  ;;  %v526_v43 = vrot.slane %v524_v35, 7  ;;  %v459_v6 = vld [vmem:[%s3505_s15 + $0x60] sm:$0xff] }
  0x35   : > { %658 = vst [vmem:[#allocation2 + $0x20] sm:$0x1] %v657_v34  ;;  %v544_v45 = vshll.u32 %v470_v30, 16  ;;  %v471_v46 = vpack.c.bf16 %v455_v31, %v455_v31  ;;  %v472_v47 = vpack.c.bf16 %v456_v32, %v456_v32  ;;  %v535_v48 = vrot.slane %v533_v40, 7  ;;  %v670_v55 = vld [vmem:[#allocation2 + $0x38] sm:$0x1] }
  0x36   : > { %661 = vst [vmem:[#allocation2 + $0x24] sm:$0xf] %v660_v39  ;;  %v543_v50 = vrot.slane %v541_v42, 7  ;;  %v473_v51 = vpack.c.bf16 %v457_v37, %v457_v37  ;;  %v474_v52 = vpack.c.bf16 %v458_v38, %v458_v38  ;;  %v529_v53 = vor.u32 %v527_v36, %v526_v43  ;;  %v673_v4 = vld [vmem:[#allocation2 + $0x3c] sm:$0xf]  ;;  %v460_v16 = vld [vmem:[%s3505_s15 + $0x68] sm:$0xff] }
  0x37   : > { %v531_v54 = vrot.slane %v526_v43, 4  ;;  %v550_v56 = vshrl.u32 %v471_v46, 16  ;;  %v553_v57 = vshll.u32 %v471_v46, 16  ;;  %v538_v59 = vor.u32 %v536_v41, %v535_v48  ;;  %v677_v11 = vld [vmem:[#allocation2 + $0x44] sm:$0x1]  ;;  %v461_v26 = vld [vmem:[%s3505_s15 + $0x70] sm:$0xff] }
  0x38   : > { %v539_v60 = vrot.slane %v535_v48, 4  ;;  %v546_v61 = vor.u32 %v544_v45, %v543_v50  ;;  %v548_v62 = vrot.slane %v543_v50, 4  ;;  %v530_v63 = vsel %vm3541_vm8, %v522_v28, %v529_v53  ;;  %v680_v18 = vld [vmem:[#allocation2 + $0x48] sm:$0xf]  ;;  %v462_v31 = vld [vmem:[%s3505_s15 + $0x78] sm:$0xff]  ;;  %s3619_s15 = scalar_lea.vmem [#allocation3], %s3455_s13 }
  0x39   : > { %v664_v2 = vsel %vm3443_vm2, %v531_v54, %v663_v44  ;;  %v552_v3 = vrot.slane %v550_v56, 7  ;;  %v558_v5 = vshrl.u32 %v472_v47, 16  ;;  %662 = vst.msk [vmem:[#allocation2 + $0x28] sm:$0xf] %vm642_vm5, %v530_v63  ;;  %v667_v7 = vsel %vm3535_vm7, %v538_v59, %v666_v49  ;;  %v684_v36 = vld [vmem:[#allocation2 + $0x50] sm:$0x1] }
  0x3a   : > { %v547_v8 = vsel %vm3541_vm8, %v539_v60, %v546_v61  ;;  %v671_v9 = vsel %vm3443_vm2, %v548_v62, %v670_v55  ;;  %v561_v10 = vshll.u32 %v472_v47, 16  ;;  %665 = vst [vmem:[#allocation2 + $0x2c] sm:$0x1] %v664_v2  ;;  %v567_v15 = vshrl.u32 %v473_v51, 16  ;;  %v687_v42 = vld [vmem:[#allocation2 + $0x54] sm:$0xf] }
  0x3b   : > { %v555_v12 = vor.u32 %v553_v57, %v552_v3  ;;  %v556_v13 = vrot.slane %v552_v3, 4  ;;  %v560_v14 = vrot.slane %v558_v5, 7  ;;  %668 = vst [vmem:[#allocation2 + $0x30] sm:$0xf] %v667_v7  ;;  %v570_v17 = vshll.u32 %v473_v51, 16  ;;  %p2868_p4 = scmp.le.s32.totalorder %s3310_s21, 0 }
  0x3c   : > { %v575_v19 = vshrl.u32 %v474_v52, 16  ;;  %v578_v20 = vshll.u32 %v474_v52, 16  ;;  %v475_v21 = vpack.c.bf16 %v459_v6, %v459_v6  ;;  %669 = vst.msk [vmem:[#allocation2 + $0x34] sm:$0xf] %vm642_vm5, %v547_v8  ;;  %v569_v25 = vrot.slane %v567_v15, 7 }
  0x3d   : > { %v674_v22 = vsel %vm3535_vm7, %v555_v12, %v673_v4  ;;  %v563_v23 = vor.u32 %v561_v10, %v560_v14  ;;  %v565_v24 = vrot.slane %v560_v14, 4  ;;  %672 = vst [vmem:[#allocation2 + $0x38] sm:$0x1] %v671_v9  ;;  %v476_v30 = vpack.c.bf16 %v460_v16, %v460_v16  ;;  %v691_v55 = vld [vmem:[#allocation2 + $0x5c] sm:$0x1] }
  0x3e   : > { %v577_v27 = vrot.slane %v575_v19, 7  ;;  %v584_v28 = vshrl.u32 %v475_v21, 16  ;;  %v587_v29 = vshll.u32 %v475_v21, 16  ;;  %675 = vst [vmem:[#allocation2 + $0x3c] sm:$0xf] %v674_v22  ;;  %v572_v34 = vor.u32 %v570_v17, %v569_v25 }
  0x3f   : > { %v564_v32 = vsel %vm3541_vm8, %v556_v13, %v563_v23  ;;  %v678_v33 = vsel %vm3443_vm2, %v565_v24, %v677_v11  ;;  %v573_v35 = vrot.slane %v569_v25, 4  ;;  %v592_v40 = vshrl.u32 %v476_v30, 16  ;;  %v694_v62 = vld [vmem:[#allocation2 + $0x60] sm:$0xf]  ;;  %v698_v5 = vld [vmem:[#allocation2 + $0x68] sm:$0x1] }
  0x40   : > { %676 = vst.msk [vmem:[#allocation2 + $0x40] sm:$0xf] %vm642_vm5, %v564_v32  ;;  %v580_v37 = vor.u32 %v578_v20, %v577_v27  ;;  %v582_v38 = vrot.slane %v577_v27, 4  ;;  %v586_v39 = vrot.slane %v584_v28, 7  ;;  %v681_v41 = vsel %vm3535_vm7, %v572_v34, %v680_v18 }
  0x41   : > { %679 = vst [vmem:[#allocation2 + $0x44] sm:$0x1] %v678_v33  ;;  %v595_v43 = vshll.u32 %v476_v30, 16  ;;  %v477_v44 = vpack.c.bf16 %v461_v26, %v461_v26  ;;  %v478_v45 = vpack.c.bf16 %v462_v31, %v462_v31  ;;  %v594_v50 = vrot.slane %v592_v40, 7 }
  0x42   : > { %682 = vst [vmem:[#allocation2 + $0x48] sm:$0xf] %v681_v41  ;;  %v581_v46 = vsel %vm3541_vm8, %v573_v35, %v580_v37  ;;  %v685_v47 = vsel %vm3443_vm2, %v582_v38, %v684_v36  ;;  %v589_v48 = vor.u32 %v587_v29, %v586_v39  ;;  %v590_v49 = vrot.slane %v586_v39, 4 }
  0x43   : > { %683 = vst.msk [vmem:[#allocation2 + $0x4c] sm:$0xf] %vm642_vm5, %v581_v46  ;;  %v601_v51 = vshrl.u32 %v477_v44, 16  ;;  %v604_v52 = vshll.u32 %v477_v44, 16  ;;  %v609_v53 = vshrl.u32 %v478_v45, 16  ;;  %v612_v56 = vshll.u32 %v478_v45, 16 }
  0x44   : > { %686 = vst [vmem:[#allocation2 + $0x50] sm:$0x1] %v685_v47  ;;  %v688_v54 = vsel %vm3535_vm7, %v589_v48, %v687_v42  ;;  %v597_v57 = vor.u32 %v595_v43, %v594_v50  ;;  %v599_v59 = vrot.slane %v594_v50, 4 }
  0x45   : > { %689 = vst [vmem:[#allocation2 + $0x54] sm:$0xf] %v688_v54  ;;  %v603_v60 = vrot.slane %v601_v51, 7  ;;  %v611_v61 = vrot.slane %v609_v53, 7 }
  0x46   : > { %v598_v63 = vsel %vm3541_vm8, %v590_v49, %v597_v57  ;;  %v692_v2 = vsel %vm3443_vm2, %v599_v59, %v691_v55 }
  0x47   : > { %v606_v3 = vor.u32 %v604_v52, %v603_v60  ;;  %v607_v4 = vrot.slane %v603_v60, 4  ;;  %690 = vst.msk [vmem:[#allocation2 + $0x58] sm:$0xf] %vm642_vm5, %v598_v63  ;;  %v614_v6 = vor.u32 %v612_v56, %v611_v61  ;;  %v616_v7 = vrot.slane %v611_v61, 4 }
  0x48   : > { %693 = vst [vmem:[#allocation2 + $0x5c] sm:$0x1] %v692_v2  ;;  %704 = sbr.rel (%p2868_p4) target bundleno = 90 (0x5a), region = 44 }
  0x49   : > { %v695_v8 = vsel %vm3535_vm7, %v606_v3, %v694_v62  ;;  %v615_v9 = vsel %vm3541_vm8, %v607_v4, %v614_v6  ;;  %v699_v10 = vsel %vm3443_vm2, %v616_v7, %v698_v5 }
  0x4a   : > { %696 = vst [vmem:[#allocation2 + $0x60] sm:$0xf] %v695_v8 }
  0x4b   : > { %697 = vst.msk [vmem:[#allocation2 + $0x64] sm:$0xf] %vm642_vm5, %v615_v9 }
  0x4c   : > { %700 = vst [vmem:[#allocation2 + $0x68] sm:$0x1] %v699_v10 }
  0x4d   : > { %v705_v11 = vld [vmem:[%s3525_s30] sm:$0xff]  ;;  %v706_v12 = vld [vmem:[%s3525_s30 + $0x8] sm:$0xff] }
  0x4e   : > { %v707_v13 = vpack.c.bf16 %v705_v11, %v705_v11  ;;  %v708_v14 = vpack.c.bf16 %v706_v12, %v706_v12  ;;  %v729_v21 = vld [vmem:[#allocation2] sm:$0xf]  ;;  %v733_v22 = vld [vmem:[#allocation2 + $0x8] sm:$0x1] }
  0x50   : > { %v710_v15 = vshrl.u32 %v707_v13, 16  ;;  %v713_v16 = vshll.u32 %v707_v13, 16  ;;  %v718_v17 = vshrl.u32 %v708_v14, 16  ;;  %v721_v18 = vshll.u32 %v708_v14, 16 }
  0x52   : > { %v712_v19 = vrot.slane %v710_v15, 7  ;;  %v720_v20 = vrot.slane %v718_v17, 7 }
  0x54   : > { %v715_v23 = vor.u32 %v713_v16, %v712_v19  ;;  %v716_v24 = vrot.slane %v712_v19, 4  ;;  %v723_v25 = vor.u32 %v721_v18, %v720_v20  ;;  %v725_v26 = vrot.slane %v720_v20, 4 }
  0x56   : > { %v730_v27 = vsel %vm3535_vm7, %v715_v23, %v729_v21  ;;  %v724_v28 = vsel %vm3541_vm8, %v716_v24, %v723_v25  ;;  %v734_v29 = vsel %vm3443_vm2, %v725_v26, %v733_v22 }
  0x57   : > { %731 = vst [vmem:[#allocation2] sm:$0xf] %v730_v27 }
  0x58   : > { %732 = vst.msk [vmem:[#allocation2 + $0x4] sm:$0xf] %vm642_vm5, %v724_v28 }
  0x59   : > { %735 = vst [vmem:[#allocation2 + $0x8] sm:$0x1] %v734_v29 }
  0x5a PF: > { %p2869_p5 = scmp.ne.s32.totalorder %s3310_s21, 0 }
  0x5c   : > { %739 = sbr.rel (%p2869_p5) target bundleno = 101 (0x65), region = 48 }
  0x61   : > { %v740_v30 = vld [vmem:[#allocation2] sm:$0xf]  ;;  %v744_v31 = vld [vmem:[#allocation2 + $0x8] sm:$0x1]  ;;  %v3328_v33 = vmov 0  }
  0x62   : > { %v741_v32 = vsel %vm3535_vm7, 0, %v740_v30  ;;  %743 = vst.msk [vmem:[#allocation2 + $0x4] sm:$0xf] %vm642_vm5, %v3328_v33  ;;  %v745_v34 = vsel %vm3443_vm2, 0, %v744_v31 }
  0x63   : > { %742 = vst [vmem:[#allocation2] sm:$0xf] %v741_v32 }
  0x64   : > { %746 = vst [vmem:[#allocation2 + $0x8] sm:$0x1] %v745_v34 }
  0x65 PF: > { %p2870_p6 = scmp.ge.s32.totalorder %s3310_s21, 1 }
  0x67   : > { %750 = sbr.rel (%p2870_p6) target bundleno = 121 (0x79), region = 52 }
  0x6c   : > { %v751_v35 = vld [vmem:[%s3558_s8] sm:$0xff]  ;;  %v752_v36 = vld [vmem:[%s3558_s8 + $0x8] sm:$0xff]  ;;  %v780_v46 = vld [vmem:[#allocation2 + $0x74] sm:$0x1] }
  0x6d   : > { %v753_v37 = vpack.c.bf16 %v751_v35, %v751_v35  ;;  %v754_v38 = vpack.c.bf16 %v752_v36, %v752_v36  ;;  %v776_v45 = vld [vmem:[#allocation2 + $0x6c] sm:$0xf] }
  0x6f   : > { %v756_v39 = vshrl.u32 %v753_v37, 16  ;;  %v759_v40 = vshll.u32 %v753_v37, 16  ;;  %v764_v41 = vshrl.u32 %v754_v38, 16  ;;  %v767_v42 = vshll.u32 %v754_v38, 16 }
  0x71   : > { %v758_v43 = vrot.slane %v756_v39, 7  ;;  %v766_v44 = vrot.slane %v764_v41, 7 }
  0x73   : > { %v761_v47 = vor.u32 %v759_v40, %v758_v43  ;;  %v762_v48 = vrot.slane %v758_v43, 4  ;;  %v769_v49 = vor.u32 %v767_v42, %v766_v44  ;;  %v771_v50 = vrot.slane %v766_v44, 4 }
  0x75   : > { %v777_v51 = vsel %vm3535_vm7, %v761_v47, %v776_v45  ;;  %v770_v52 = vsel %vm3541_vm8, %v762_v48, %v769_v49  ;;  %v781_v53 = vsel %vm3443_vm2, %v771_v50, %v780_v46 }
  0x76   : > { %778 = vst [vmem:[#allocation2 + $0x6c] sm:$0xf] %v777_v51 }
  0x77   : > { %779 = vst.msk [vmem:[#allocation2 + $0x70] sm:$0xf] %vm642_vm5, %v770_v52 }
  0x78   : > { %782 = vst [vmem:[#allocation2 + $0x74] sm:$0x1] %v781_v53 }
  0x79 PF: > { %p2871_p7 = scmp.ne.s32.totalorder %s3310_s21, 1 }
  0x7b   : > { %786 = sbr.rel (%p2871_p7) target bundleno = 132 (0x84), region = 56 }
  0x80   : > { %v788_v54 = vld [vmem:[#allocation2 + $0x6c] sm:$0xf]  ;;  %v792_v55 = vld [vmem:[#allocation2 + $0x74] sm:$0x1]  ;;  %v3329_v57 = vmov 0  }
  0x81   : > { %v789_v56 = vsel %vm3535_vm7, 0, %v788_v54  ;;  %791 = vst.msk [vmem:[#allocation2 + $0x70] sm:$0xf] %vm642_vm5, %v3329_v57  ;;  %v793_v0 = vsel %vm3443_vm2, 0, %v792_v55 }
  0x82   : > { %790 = vst [vmem:[#allocation2 + $0x6c] sm:$0xf] %v789_v56 }
  0x83   : > { %794 = vst [vmem:[#allocation2 + $0x74] sm:$0x1] %v793_v0 }
  0x84 PF: > { %v804_v59 = vld [vmem:[#allocation2 + $0x34] sm:$0xf]  ;;  %v815_v60 = vld [vmem:[#allocation2 + $0x38] sm:$0x1]  ;;  %v1018_v61 = vld [vmem:[#allocation2 + $0x30] sm:$0xe] }
  0x85   : > { %vm1046_vm9 = vcmask 1042432   ;;  %vm1047_vm10 = vcmask 1046532   ;;  %v2876_v62 = vrot.slane %v1018_v61, 9  ;;  %v1079_v63 = vrot.slane %v804_v59, 5  ;;  %v803_v3 = vld [vmem:[#allocation2 + $0x30] sm:$0xf] }
  0x86   : > { %vm3653_vm11 = vmor %vm1046_vm9, %vm1047_vm10  ;;  %v1082_v58 = vrot.slane %v815_v60, 5  ;;  %vm819_vm12 = vsmask.f32 3328  ;;  %v928_v4 = vshll.u32 %v804_v59, 16  ;;  %vm820_vm13 = vsmask.f32 7440 }
  0x87   : > { %v1080_v1 = vsel %vm3653_vm11, %v2876_v62, %v1079_v63  ;;  %v1081_v5 = vrot.slane %v1079_v63, 4  ;;  %v919_v6 = vshrl.u32 %v803_v3, 16  ;;  %v808_v7 = vld [vmem:[#allocation2 + $0x4c] sm:$0xf]  ;;  %v922_v9 = vshll.u32 %v803_v3, 16  ;;  %v3053_v18 = vld [vmem:[#allocation2 + $0x3c] sm:$0xff]  ;;  %vm3666_vm14 = vmor %vm819_vm12, %vm820_vm13 }
  0x88   : > { %v1794_v8 = vunpack.c.l.b16 %v1080_v1  ;;  %v930_v10 = vrot.slane %v928_v4, 5  ;;  %v932_v11 = vshrl.u32 %v804_v59, 16  ;;  %v817_v12 = vld [vmem:[#allocation2 + $0x50] sm:$0x1]  ;;  %v938_v15 = vshll.u32 %v815_v60, 16  ;;  %s3330_s13 = smov 24  }
  0x89   : > { %v1083_v13 = vsel %vm3653_vm11, %v1081_v5, %v1082_v58  ;;  %v921_v14 = vrot.slane %v919_v6, 4  ;;  %v1020_v16 = vld [vmem:[#allocation2 + $0x48] sm:$0xe]  ;;  %v1093_v17 = vrot.slane %v808_v7, 5  ;;  %v924_v20 = vrot.slane %v922_v9, 5  ;;  %1866 = vrot.lane.b32.xlu2 %v3053_v18, %s3330_s13  ;;  %s3331_s9 = smov 16  }
  0x8a   : > { %v1795_v19 = vunpack.c.l.b16 %v1083_v13  ;;  %v934_v21 = vrot.slane %v932_v11, 4  ;;  %v2878_v22 = vrot.slane %v1020_v16, 9  ;;  %v807_v23 = vld [vmem:[#allocation2 + $0x48] sm:$0xf]  ;;  %v940_v24 = vrot.slane %v938_v15, 5  ;;  %v3055_v47 = vld [vmem:[#allocation2 + $0x54] sm:$0xff] }
  0x8b   : > { %v1095_v25 = vrot.slane %v1093_v17, 4  ;;  %v1096_v26 = vrot.slane %v817_v12, 5  ;;  %v967_v27 = vshrl.u32 %v807_v23, 16  ;;  %v925_v29 = vor.u32 %v924_v20, %v921_v14  ;;  %v1117_v32 = vld [vmem:[#allocation2 + $0x54] sm:$0xf]  ;;  %s3332_s10 = smov 8  }
  0x8c   : > { %v1806_v28 = vpack.c.b16 %v1795_v19, %v1794_v8  ;;  %v935_v30 = vor.u32 %v934_v21, %v930_v10  ;;  %v1094_v31 = vsel %vm3653_vm11, %v2878_v22, %v1093_v17  ;;  %v970_v37 = vshll.u32 %v807_v23, 16  ;;  %v3673_v42 = vld [vmem:[#allocation2 + $0x58] sm:$0xf]  ;;  %v3679_v56 = vld [vmem:[#allocation2 + $0x5c] sm:$0x1]  ;;  %s3333_s30 = smov 32  }
  0x8d   : > { %v1097_v34 = vsel %vm3653_vm11, %v1095_v25, %v1096_v26  ;;  %v1798_v35 = vunpack.c.l.b16 %v1094_v31  ;;  %v969_v36 = vrot.slane %v967_v27, 4  ;;  %v926_v38 = vrot.slane %v925_v29, 4  ;;  %v1113_v57 = vld [vmem:[#allocation2 + $0x3c] sm:$0xf]  ;;  %v3685_v6 = vld [vmem:[#allocation2 + $0x40] sm:$0xf] }
  0x8e   : > { %1818 = vrot.lane.b32.xlu1 %v1806_v28, %s3331_s9  ;;  %v936_v39 = vrot.slane %v935_v30, 4  ;;  %v1799_v40 = vunpack.c.l.b16 %v1097_v34  ;;  %v976_v41 = vshll.u32 %v808_v7, 16  ;;  %v972_v43 = vrot.slane %v970_v37, 5  ;;  %v3690_v11 = vld [vmem:[#allocation2 + $0x44] sm:$0x1]  ;;  %s3334_s26 = smov 48  }
  0x8f   : > { %v980_v44 = vshrl.u32 %v808_v7, 16  ;;  %v986_v45 = vshll.u32 %v817_v12, 16  ;;  %v1274_v46 = vshrl.u32 %v1117_v32, 16  ;;  %v931_v48 = vsel %vm3666_vm14, %v926_v38, %v930_v10  ;;  %v1327_v17 = vld [vmem:[#allocation2 + $0x54] sm:$0xe]  ;;  %s3335_s14 = smov 40  }
  0x90   : > { %v941_v49 = vsel %vm3666_vm14, %v936_v39, %v940_v24  ;;  %v1808_v50 = vpack.c.b16 %v1799_v40, %v1798_v35  ;;  %v978_v51 = vrot.slane %v976_v41, 5  ;;  %v1754_v52 = vunpack.c.l.b16 %v931_v48  ;;  %v799_v30 = vld [vmem:[#allocation2 + $0x18] sm:$0xf]  ;;  %s3336_s27 = smov 56   ;;  %s3337_s17 = smov 64  }
  0x91   : > { %v1755_v53 = vunpack.c.l.b16 %v941_v49  ;;  %v973_v54 = vor.u32 %v972_v43, %v969_v36  ;;  %v982_v55 = vrot.slane %v980_v44, 4  ;;  %v988_v0 = vrot.slane %v986_v45, 5  ;;  %1870 = vrot.lane.b32.xlu2 %v3055_v47, %s3330_s13  ;;  %v3704_v44 = vld [vmem:[#allocation2 + $0x1c] sm:$0xf]  ;;  %v3711_v49 = vld [vmem:[#allocation2 + $0x20] sm:$0x1] }
  0x92   : > { %v1276_v59 = vrot.slane %v1274_v46, 4  ;;  %v1277_v60 = vshll.u32 %v1117_v32, 16  ;;  %v1283_v61 = vshll.u32 %v3673_v42, 16  ;;  %v1287_v3 = vshrl.u32 %v3673_v42, 16  ;;  %s2705_s16 = sshll.u32 %s3619_s15, 4  ;;  %s2706_s16 = int_to_ptr.vmem [resolvable:$true] %s2705_s16 }
  0x93   : > { %v1766_v62 = vpack.c.b16 %v1755_v53, %v1754_v52  ;;  %v974_v63 = vrot.slane %v973_v54, 4  ;;  %v983_v58 = vor.u32 %v982_v55, %v978_v51  ;;  %v1293_v5 = vshll.u32 %v3679_v56, 16  ;;  %v1325_v54 = vld [vmem:[#allocation2 + $0x3c] sm:$0xe] }
  0x94   : > { %v1279_v4 = vrot.slane %v1277_v60, 5  ;;  %v1285_v1 = vrot.slane %v1283_v61, 5  ;;  %v1226_v7 = vshrl.u32 %v1113_v57, 16  ;;  %v1289_v10 = vrot.slane %v1287_v3, 4 }
  0x95   : > { %1778 = vrot.lane.b32.xlu0 %v1766_v62, %s3332_s10  ;;  %v979_v8 = vsel %vm3666_vm14, %v974_v63, %v978_v51  ;;  %v984_v9 = vrot.slane %v983_v58, 4  ;;  %v1229_v12 = vshll.u32 %v1113_v57, 16  ;;  %v1295_v15 = vrot.slane %v1293_v5, 5  ;;  %v795_v63 = vld [vmem:[#allocation2] sm:$0xf] }
  0x96   : > { %1822 = vrot.lane.b32.xlu1 %v1808_v50, %s3331_s9  ;;  %v1758_v13 = vunpack.c.l.b16 %v979_v8  ;;  %v1280_v14 = vor.u32 %v1279_v4, %v1276_v59  ;;  %v1228_v16 = vrot.slane %v1226_v7, 4  ;;  %v1290_v19 = vor.u32 %v1289_v10, %v1285_v1  ;;  %v796_v10 = vld [vmem:[#allocation2 + $0x4] sm:$0xf] }
  0x97   : > { %v989_v18 = vsel %vm3666_vm14, %v984_v9, %v988_v0  ;;  %v1231_v20 = vrot.slane %v1229_v12, 5  ;;  %v1235_v21 = vshll.u32 %v3685_v6, 16  ;;  %v1239_v24 = vshrl.u32 %v3685_v6, 16 }
  0x98   : > { %v1759_v22 = vunpack.c.l.b16 %v989_v18  ;;  %v1281_v23 = vrot.slane %v1280_v14, 4  ;;  %v1245_v25 = vshll.u32 %v3690_v11, 16  ;;  %v1291_v26 = vrot.slane %v1290_v19, 4 }
  0x99   : > { %v1232_v27 = vor.u32 %v1231_v20, %v1228_v16  ;;  %v1237_v28 = vrot.slane %v1235_v21, 5  ;;  %v2886_v29 = vrot.slane %v1327_v17, 9  ;;  %v1241_v34 = vrot.slane %v1239_v24, 4  ;;  %v3061_v16 = vld [vmem:[#allocation2 + $0x48] sm:$0xff] }
  0x9a   : > { %v1768_v31 = vpack.c.b16 %v1759_v22, %v1758_v13  ;;  %v1286_v32 = vsel %vm3666_vm14, %v1281_v23, %v1285_v1  ;;  %v1247_v35 = vrot.slane %v1245_v25, 5  ;;  %v1296_v36 = vsel %vm3666_vm14, %v1291_v26, %v1295_v15  ;;  %v811_v20 = vld [vmem:[#allocation2 + $0x8] sm:$0x1]  ;;  %v1014_v25 = vld [vmem:[#allocation2] sm:$0xe] }
  0x9b   : > { %v1886_v37 = vunpack.c.l.b16 %v1286_v32  ;;  %v1233_v38 = vrot.slane %v1232_v27, 4  ;;  %v1397_v39 = vrot.slane %v3673_v42, 5  ;;  %v1887_v40 = vunpack.c.l.b16 %v1296_v36 }
  0x9c   : > { %v1242_v41 = vor.u32 %v1241_v34, %v1237_v28  ;;  %v1400_v43 = vrot.slane %v3679_v56, 5  ;;  %v871_v45 = vshrl.u32 %v799_v30, 16  ;;  %v874_v50 = vshll.u32 %v799_v30, 16 }
  0x9d   : > { %1782 = vrot.lane.b32.xlu0 %v1768_v31, %s3332_s10  ;;  %v1238_v46 = vsel %vm3666_vm14, %v1233_v38, %v1237_v28  ;;  %v1398_v47 = vsel %vm3653_vm11, %v2886_v29, %v1397_v39  ;;  %v1399_v48 = vrot.slane %v1397_v39, 4  ;;  %v1896_v42 = vpack.c.b16 %v1887_v40, %v1886_v37  ;;  %v1422_v38 = vld [vmem:[#allocation2 + $0x60] sm:$0xf] }
  0x9e   : > { %v1243_v51 = vrot.slane %v1242_v41, 4  ;;  %v1882_v52 = vunpack.c.l.b16 %v1238_v46  ;;  %v1926_v53 = vunpack.c.l.b16 %v1398_v47  ;;  %v873_v56 = vrot.slane %v871_v45, 4  ;;  %v1423_v45 = vld [vmem:[#allocation2 + $0x64] sm:$0xf] }
  0x9f   : > { %v1401_v55 = vsel %vm3653_vm11, %v1399_v48, %v1400_v43  ;;  %v876_v57 = vrot.slane %v874_v50, 5  ;;  %v880_v0 = vshll.u32 %v3704_v44, 16  ;;  %1910 = vrot.lane.b32.xlu1 %v1896_v42, %s3333_s30  ;;  %v884_v61 = vshrl.u32 %v3704_v44, 16 }
  0xa0   : > { %v1248_v59 = vsel %vm3666_vm14, %v1243_v51, %v1247_v35  ;;  %v1927_v60 = vunpack.c.l.b16 %v1401_v55  ;;  %v890_v62 = vshll.u32 %v3711_v49, 16  ;;  %v2884_v1 = vrot.slane %v1325_v54, 9 }
  0xa1   : > { %v1883_v58 = vunpack.c.l.b16 %v1248_v59  ;;  %v877_v3 = vor.u32 %v876_v57, %v873_v56  ;;  %v882_v4 = vrot.slane %v880_v0, 5  ;;  %v886_v7 = vrot.slane %v884_v61, 4  ;;  %v1632_v59 = vld [vmem:[#allocation2 + $0x60] sm:$0xe] }
  0xa2   : > { %v1936_v5 = vpack.c.b16 %v1927_v60, %v1926_v53  ;;  %v892_v8 = vrot.slane %v890_v62, 5  ;;  %v1383_v9 = vrot.slane %v3685_v6, 5  ;;  %v1386_v14 = vrot.slane %v3690_v11, 5  ;;  %v1432_v53 = vld [vmem:[#allocation2 + $0x68] sm:$0x1] }
  0xa3   : > { %v1894_v12 = vpack.c.b16 %v1883_v58, %v1882_v52  ;;  %v878_v13 = vrot.slane %v877_v3, 4  ;;  %v823_v15 = vshrl.u32 %v795_v63, 16  ;;  %v887_v17 = vor.u32 %v886_v7, %v882_v4  ;;  %v1418_v7 = vld [vmem:[#allocation2 + $0x48] sm:$0xf] }
  0xa4   : > { %v1384_v18 = vsel %vm3653_vm11, %v2884_v1, %v1383_v9  ;;  %v1385_v19 = vrot.slane %v1383_v9, 4  ;;  %v826_v21 = vshll.u32 %v795_v63, 16  ;;  %v832_v24 = vshll.u32 %v796_v10, 16 }
  0xa5   : > { %1906 = vrot.lane.b32.xlu0 %v1894_v12, %s3333_s30  ;;  %v883_v22 = vsel %vm3666_vm14, %v878_v13, %v882_v4  ;;  %v1922_v6 = vunpack.c.l.b16 %v1384_v18  ;;  %v825_v23 = vrot.slane %v823_v15, 4  ;;  %v888_v26 = vrot.slane %v887_v17, 4  ;;  %v1419_v17 = vld [vmem:[#allocation2 + $0x4c] sm:$0xf] }
  0xa6   : > { %v1750_v11 = vunpack.c.l.b16 %v883_v22  ;;  %v1387_v27 = vsel %vm3653_vm11, %v1385_v19, %v1386_v14  ;;  %v828_v28 = vrot.slane %v826_v21, 5  ;;  %v834_v30 = vrot.slane %v832_v24, 5 }
  0xa7   : > { %v1923_v29 = vunpack.c.l.b16 %v1387_v27  ;;  %v836_v31 = vshrl.u32 %v796_v10, 16  ;;  %v842_v32 = vshll.u32 %v811_v20, 16  ;;  %1994 = vrot.lane.b32.xlu1 %v3061_v16, %s3334_s26  ;;  %v893_v34 = vsel %vm3666_vm14, %v888_v26, %v892_v8 }
  0xa8   : > { %v829_v35 = vor.u32 %v828_v28, %v825_v23  ;;  %v2872_v36 = vrot.slane %v1014_v25, 9  ;;  %v1051_v37 = vrot.slane %v796_v10, 5  ;;  %v1751_v39 = vunpack.c.l.b16 %v893_v34  ;;  %v3063_v10 = vld [vmem:[#allocation2 + $0x60] sm:$0xff]  ;;  %v1430_v25 = vld [vmem:[#allocation2 + $0x50] sm:$0x1] }
  0xa9   : > { %v1934_v40 = vpack.c.b16 %v1923_v29, %v1922_v6  ;;  %v838_v41 = vrot.slane %v836_v31, 4  ;;  %v844_v43 = vrot.slane %v842_v32, 5  ;;  %v1054_v50 = vrot.slane %v811_v20, 5  ;;  %v1630_v29 = vld [vmem:[#allocation2 + $0x48] sm:$0xe] }
  0xaa   : > { %v830_v46 = vrot.slane %v829_v35, 4  ;;  %v1052_v47 = vsel %vm3653_vm11, %v2872_v36, %v1051_v37  ;;  %v1053_v48 = vrot.slane %v1051_v37, 4  ;;  %v1764_v42 = vpack.c.b16 %v1751_v39, %v1750_v11  ;;  %v1105_v39 = vld [vmem:[#allocation2 + $0xc] sm:$0xf] }
  0xab   : > { %1946 = vrot.lane.b32.xlu2 %v1934_v40, %s3335_s14  ;;  %v839_v51 = vor.u32 %v838_v41, %v834_v30  ;;  %v1786_v52 = vunpack.c.l.b16 %v1052_v47  ;;  %v1579_v54 = vshrl.u32 %v1422_v38, 16  ;;  %v1582_v57 = vshll.u32 %v1422_v38, 16 }
  0xac   : > { %v835_v55 = vsel %vm3666_vm14, %v830_v46, %v834_v30  ;;  %v1055_v56 = vsel %vm3653_vm11, %v1053_v48, %v1054_v50  ;;  %v1588_v0 = vshll.u32 %v1423_v45, 16  ;;  %v1592_v4 = vshrl.u32 %v1423_v45, 16 }
  0xad   : > { %1950 = vrot.lane.b32.xlu0 %v1936_v5, %s3335_s14  ;;  %v840_v60 = vrot.slane %v839_v51, 4  ;;  %v1746_v61 = vunpack.c.l.b16 %v835_v55  ;;  %v1787_v62 = vunpack.c.l.b16 %v1055_v56  ;;  %v1581_v63 = vrot.slane %v1579_v54, 4 }
  0xae   : > { %v1584_v58 = vrot.slane %v1582_v57, 5  ;;  %v1590_v3 = vrot.slane %v1588_v0, 5  ;;  %v1598_v1 = vshll.u32 %v1432_v53, 16  ;;  %v2894_v12 = vrot.slane %v1632_v59, 9 }
  0xaf   : > { %v845_v8 = vsel %vm3666_vm14, %v840_v60, %v844_v43  ;;  %v1802_v9 = vpack.c.b16 %v1787_v62, %v1786_v52  ;;  %v1702_v13 = vrot.slane %v1423_v45, 5  ;;  %1774 = vrot.lane.b32.xlu1 %v1764_v42, %s3332_s10  ;;  %v1594_v15 = vrot.slane %v1592_v4, 4  ;;  %v3755_v52 = vld [vmem:[#allocation2 + $0x10] sm:$0xf] }
  0xb0   : > { %v1747_v14 = vunpack.c.l.b16 %v845_v8  ;;  %v1585_v5 = vor.u32 %v1584_v58, %v1581_v63  ;;  %v1600_v16 = vrot.slane %v1598_v1, 5  ;;  %v1705_v20 = vrot.slane %v1432_v53, 5 }
  0xb1   : > { %v1703_v18 = vsel %vm3653_vm11, %v2894_v12, %v1702_v13  ;;  %v1704_v19 = vrot.slane %v1702_v13, 4  ;;  %v1531_v21 = vshrl.u32 %v1418_v7, 16  ;;  %v1595_v23 = vor.u32 %v1594_v15, %v1590_v3 }
  0xb2   : > { %v1762_v22 = vpack.c.b16 %v1747_v14, %v1746_v61  ;;  %v1586_v6 = vrot.slane %v1585_v5, 4  ;;  %v2054_v24 = vunpack.c.l.b16 %v1703_v18  ;;  %v1534_v27 = vshll.u32 %v1418_v7, 16  ;;  %v3759_v61 = vld [vmem:[#allocation2 + $0x14] sm:$0x1]  ;;  %v1016_v7 = vld [vmem:[#allocation2 + $0x18] sm:$0xe] }
  0xb3   : > { %1998 = vrot.lane.b32.xlu2 %v3063_v10, %s3334_s26  ;;  %v1706_v26 = vsel %vm3653_vm11, %v1704_v19, %v1705_v20  ;;  %v1533_v11 = vrot.slane %v1531_v21, 4  ;;  %v1540_v28 = vshll.u32 %v1419_v17, 16  ;;  %v1596_v31 = vrot.slane %v1595_v23, 4  ;;  %v3772_v21 = vld [vmem:[#allocation2 + $0x28] sm:$0xf] }
  0xb4   : > { %v1591_v30 = vsel %vm3666_vm14, %v1586_v6, %v1590_v3  ;;  %v2055_v32 = vunpack.c.l.b16 %v1706_v26  ;;  %v1544_v34 = vshrl.u32 %v1419_v17, 16  ;;  %v1536_v36 = vrot.slane %v1534_v27, 5  ;;  %v1321_v26 = vld [vmem:[#allocation2 + $0xc] sm:$0xe] }
  0xb5   : > { %1770 = vrot.lane.b32.xlu0 %v1762_v22, %s3332_s10  ;;  %v2014_v35 = vunpack.c.l.b16 %v1591_v30  ;;  %v1542_v37 = vrot.slane %v1540_v28, 5  ;;  %v1550_v38 = vshll.u32 %v1430_v25, 16  ;;  %v1601_v40 = vsel %vm3666_vm14, %v1596_v31, %v1600_v16  ;;  %v1323_v16 = vld [vmem:[#allocation2 + $0x24] sm:$0xe] }
  0xb6   : > { %v2064_v41 = vpack.c.b16 %v2055_v32, %v2054_v24  ;;  %v1546_v43 = vrot.slane %v1544_v34, 4  ;;  %v2892_v45 = vrot.slane %v1630_v29, 9  ;;  %v2015_v46 = vunpack.c.l.b16 %v1601_v40 }
  0xb7   : > { %v1537_v47 = vor.u32 %v1536_v36, %v1533_v11  ;;  %v1552_v48 = vrot.slane %v1550_v38, 5  ;;  %v1688_v50 = vrot.slane %v1419_v17, 5  ;;  %1810 = vrot.lane.b32.xlu1 %v1802_v9, %s3331_s9  ;;  %v1691_v51 = vrot.slane %v1430_v25, 5  ;;  %v3775_v25 = vld [vmem:[#allocation2 + $0x2c] sm:$0x1] }
  0xb8   : > { %v1547_v42 = vor.u32 %v1546_v43, %v1542_v37  ;;  %v1130_v53 = vshrl.u32 %v1105_v39, 16  ;;  %v1133_v54 = vshll.u32 %v1105_v39, 16  ;;  %v2024_v55 = vpack.c.b16 %v2015_v46, %v2014_v35 }
  0xb9   : > { %v1538_v56 = vrot.slane %v1537_v47, 4  ;;  %v1689_v57 = vsel %vm3653_vm11, %v2892_v45, %v1688_v50  ;;  %v1690_v0 = vrot.slane %v1688_v50, 4  ;;  %v1139_v4 = vshll.u32 %v3755_v52, 16  ;;  %v3796_v50 = vld [vmem:[#allocation2 + $0x20] sm:$0x1] }
  0xba   : > { %v1548_v59 = vrot.slane %v1547_v42, 4  ;;  %v2050_v60 = vunpack.c.l.b16 %v1689_v57  ;;  %v1132_v62 = vrot.slane %v1130_v53, 4  ;;  %v1135_v63 = vrot.slane %v1133_v54, 5 }
  0xbb   : > { %v1543_v58 = vsel %vm3666_vm14, %v1538_v56, %v1542_v37  ;;  %v1692_v3 = vsel %vm3653_vm11, %v1690_v0, %v1691_v51  ;;  %v1143_v1 = vshrl.u32 %v3755_v52, 16  ;;  %v1141_v14 = vrot.slane %v1139_v4, 5  ;;  %v1109_v0 = vld [vmem:[#allocation2 + $0x24] sm:$0xf] }
  0xbc   : > { %v1553_v8 = vsel %vm3666_vm14, %v1548_v59, %v1552_v48  ;;  %v2010_v9 = vunpack.c.l.b16 %v1543_v58  ;;  %v2051_v10 = vunpack.c.l.b16 %v1692_v3  ;;  %v1136_v12 = vor.u32 %v1135_v63, %v1132_v62  ;;  %v3794_v48 = vld [vmem:[#allocation2 + $0x1c] sm:$0xf]  ;;  %v3051_v58 = vld [vmem:[#allocation2 + $0x24] sm:$0xff] }
  0xbd   : > { %2038 = vrot.lane.b32.xlu0 %v2024_v55, %s3336_s27  ;;  %v2011_v13 = vunpack.c.l.b16 %v1553_v8  ;;  %v1145_v5 = vrot.slane %v1143_v1, 4  ;;  %v1149_v15 = vshll.u32 %v3759_v61, 16  ;;  %v2874_v19 = vrot.slane %v1016_v7, 9 }
  0xbe   : > { %v2062_v17 = vpack.c.b16 %v2051_v10, %v2050_v60  ;;  %v1137_v18 = vrot.slane %v1136_v12, 4  ;;  %v1065_v20 = vrot.slane %v3704_v44, 5  ;;  %v1068_v24 = vrot.slane %v3711_v49, 5  ;;  %v1628_v12 = vld [vmem:[#allocation2 + $0x30] sm:$0xe] }
  0xbf   : > { %v2022_v22 = vpack.c.b16 %v2011_v13, %v2010_v9  ;;  %v1146_v6 = vor.u32 %v1145_v5, %v1141_v14  ;;  %v1151_v23 = vrot.slane %v1149_v15, 5  ;;  %2078 = vrot.lane.b32.xlu1 %v2064_v41, %s3337_s17  ;;  %v2882_v28 = vrot.slane %v1323_v16, 9  ;;  %v1410_v41 = vld [vmem:[#allocation2 + $0x18] sm:$0xf]  ;;  %v3810_v16 = vld [vmem:[#allocation2 + $0x34] sm:$0xf] }
  0xc0   : > { %v1142_v11 = vsel %vm3666_vm14, %v1137_v18, %v1141_v14  ;;  %v1066_v27 = vsel %vm3653_vm11, %v2874_v19, %v1065_v20  ;;  %v1067_v44 = vrot.slane %v1065_v20, 4  ;;  %v1369_v49 = vrot.slane %v3772_v21, 5 }
  0xc1   : > { %2034 = vrot.lane.b32.xlu2 %v2022_v22, %s3336_s27  ;;  %v1147_v29 = vrot.slane %v1146_v6, 4  ;;  %v1874_v30 = vunpack.c.l.b16 %v1142_v11  ;;  %v1790_v31 = vunpack.c.l.b16 %v1066_v27  ;;  %v1372_v34 = vrot.slane %v3775_v25, 5  ;;  %v1626_v6 = vld [vmem:[#allocation2 + $0x18] sm:$0xe]  ;;  %v3049_v27 = vld [vmem:[#allocation2 + $0xc] sm:$0xff] }
  0xc2   : > { %v1069_v32 = vsel %vm3653_vm11, %v1067_v44, %v1068_v24  ;;  %v2880_v35 = vrot.slane %v1321_v26, 9  ;;  %v1355_v36 = vrot.slane %v3755_v52, 5  ;;  %v1370_v39 = vsel %vm3653_vm11, %v2882_v28, %v1369_v49 }
  0xc3   : > { %v1152_v37 = vsel %vm3666_vm14, %v1147_v29, %v1151_v23  ;;  %v1791_v38 = vunpack.c.l.b16 %v1069_v32  ;;  %v1371_v40 = vrot.slane %v1369_v49, 4  ;;  %v1918_v45 = vunpack.c.l.b16 %v1370_v39  ;;  %v1019_v32 = vld [vmem:[#allocation2 + $0x3c] sm:$0xe] }
  0xc4   : > { %v1875_v43 = vunpack.c.l.b16 %v1152_v37  ;;  %v1356_v46 = vsel %vm3653_vm11, %v2880_v35, %v1355_v36  ;;  %v1357_v47 = vrot.slane %v1355_v36, 4  ;;  %v1358_v52 = vrot.slane %v3759_v61, 5 }
  0xc5   : > { %2074 = vrot.lane.b32.xlu0 %v2062_v17, %s3337_s17  ;;  %v1804_v42 = vpack.c.b16 %v1791_v38, %v1790_v31  ;;  %v1373_v51 = vsel %vm3653_vm11, %v1371_v40, %v1372_v34  ;;  %v1914_v53 = vunpack.c.l.b16 %v1356_v46  ;;  %v1435_v56 = vshrl.u32 %v1410_v41, 16  ;;  %v3812_v17 = vld [vmem:[#allocation2 + $0x38] sm:$0x1]  ;;  %v3825_v38 = vld [vmem:[#allocation2 + $0x40] sm:$0xf] }
  0xc6   : > { %v1890_v54 = vpack.c.b16 %v1875_v43, %v1874_v30  ;;  %v1919_v55 = vunpack.c.l.b16 %v1373_v51  ;;  %v1438_v57 = vshll.u32 %v1410_v41, 16  ;;  %v1359_v59 = vsel %vm3653_vm11, %v1357_v47, %v1358_v52 }
  0xc7   : > { %v1444_v60 = vshll.u32 %v3794_v48, 16  ;;  %v1448_v62 = vshrl.u32 %v3794_v48, 16  ;;  %v1454_v63 = vshll.u32 %v3796_v50, 16  ;;  %v1915_v61 = vunpack.c.l.b16 %v1359_v59 }
  0xc8   : > { %1898 = vrot.lane.b32.xlu1 %v1890_v54, %s3333_s30  ;;  %v1932_v3 = vpack.c.b16 %v1919_v55, %v1918_v45  ;;  %v1437_v4 = vrot.slane %v1435_v56, 4  ;;  %v1440_v1 = vrot.slane %v1438_v57, 5  ;;  %v1178_v10 = vshrl.u32 %v1109_v0, 16  ;;  %v3835_v54 = vld [vmem:[#allocation2 + $0x44] sm:$0x1] }
  0xc9   : > { %1814 = vrot.lane.b32.xlu2 %v1804_v42, %s3331_s9  ;;  %v1446_v7 = vrot.slane %v1444_v60, 5  ;;  %v1450_v8 = vrot.slane %v1448_v62, 4  ;;  %v1456_v9 = vrot.slane %v1454_v63, 5  ;;  %v1930_v13 = vpack.c.b16 %v1915_v61, %v1914_v53 }
  0xca   : > { %v1441_v14 = vor.u32 %v1440_v1, %v1437_v4  ;;  %v1181_v5 = vshll.u32 %v1109_v0, 16  ;;  %v1187_v15 = vshll.u32 %v3772_v21, 16  ;;  %v1180_v19 = vrot.slane %v1178_v10, 4  ;;  %v809_v10 = vld [vmem:[#allocation2 + $0x54] sm:$0xf] }
  0xcb   : > { %v1451_v18 = vor.u32 %v1450_v8, %v1446_v7  ;;  %v1191_v20 = vshrl.u32 %v3772_v21, 16  ;;  %v1197_v22 = vshll.u32 %v3775_v25, 16  ;;  %v2890_v11 = vrot.slane %v1628_v12, 9 }
  0xcc   : > { %v1442_v23 = vrot.slane %v1441_v14, 4  ;;  %v1183_v24 = vrot.slane %v1181_v5, 5  ;;  %v1189_v26 = vrot.slane %v1187_v15, 5  ;;  %v1674_v30 = vrot.slane %v3810_v16, 5  ;;  %v3852_v15 = vld [vmem:[#allocation2 + $0x58] sm:$0xf] }
  0xcd   : > { %1862 = vrot.lane.b32.xlu0 %v3051_v58, %s3330_s13  ;;  %v1452_v44 = vrot.slane %v1451_v18, 4  ;;  %v1193_v28 = vrot.slane %v1191_v20, 4  ;;  %v1199_v29 = vrot.slane %v1197_v22, 5  ;;  %v1677_v21 = vrot.slane %v3812_v17, 5 }
  0xce   : > { %v1447_v31 = vsel %vm3666_vm14, %v1442_v23, %v1446_v7  ;;  %v1184_v49 = vor.u32 %v1183_v24, %v1180_v19  ;;  %v2888_v25 = vrot.slane %v1626_v6, 9  ;;  %v1675_v37 = vsel %vm3653_vm11, %v2890_v11, %v1674_v30  ;;  %v3856_v6 = vld [vmem:[#allocation2 + $0x5c] sm:$0x1]  ;;  %v3059_v23 = vld [vmem:[#allocation2 + $0x30] sm:$0xff] }
  0xcf   : > { %v1457_v34 = vsel %vm3666_vm14, %v1452_v44, %v1456_v9  ;;  %v2002_v35 = vunpack.c.l.b16 %v1447_v31  ;;  %v1194_v36 = vor.u32 %v1193_v28, %v1189_v26  ;;  %v1676_v41 = vrot.slane %v1674_v30, 4  ;;  %v805_v44 = vld [vmem:[#allocation2 + $0x3c] sm:$0xf] }
  0xd0   : > { %1942 = vrot.lane.b32.xlu1 %v1932_v3, %s3335_s14  ;;  %v2003_v39 = vunpack.c.l.b16 %v1457_v34  ;;  %v1185_v40 = vrot.slane %v1184_v49, 4  ;;  %v2046_v43 = vunpack.c.l.b16 %v1675_v37  ;;  %v1660_v46 = vrot.slane %v3794_v48, 5 }
  0xd1   : > { %1858 = vrot.lane.b32.xlu2 %v3049_v27, %s3330_s13  ;;  %v1195_v45 = vrot.slane %v1194_v36, 4  ;;  %v1663_v47 = vrot.slane %v3796_v50, 5  ;;  %v2877_v42 = vrot.slane %v1019_v32, 9  ;;  %v1678_v53 = vsel %vm3653_vm11, %v1676_v41, %v1677_v21  ;;  %v1414_v50 = vld [vmem:[#allocation2 + $0x30] sm:$0xf]  ;;  %v3057_v36 = vld [vmem:[#allocation2 + $0x18] sm:$0xff] }
  0xd2   : > { %v2018_v51 = vpack.c.b16 %v2003_v39, %v2002_v35  ;;  %v1190_v52 = vsel %vm3666_vm14, %v1185_v40, %v1189_v26  ;;  %v1086_v55 = vrot.slane %v3825_v38, 5  ;;  %v2047_v0 = vunpack.c.l.b16 %v1678_v53 }
  0xd3   : > { %v1200_v56 = vsel %vm3666_vm14, %v1195_v45, %v1199_v29  ;;  %v1878_v57 = vunpack.c.l.b16 %v1190_v52  ;;  %v1661_v48 = vsel %vm3653_vm11, %v2888_v25, %v1660_v46  ;;  %v1662_v60 = vrot.slane %v1660_v46, 4 }
  0xd4   : > { %v1879_v59 = vunpack.c.l.b16 %v1200_v56  ;;  %v2042_v62 = vunpack.c.l.b16 %v1661_v48  ;;  %v1087_v63 = vsel %vm3653_vm11, %v2877_v42, %v1086_v55  ;;  %v2060_v58 = vpack.c.b16 %v2047_v0, %v2046_v43  ;;  %v1326_v42 = vld [vmem:[#allocation2 + $0x48] sm:$0xe] }
  0xd5   : > { %1938 = vrot.lane.b32.xlu0 %v1930_v13, %s3335_s14  ;;  %v1088_v3 = vrot.slane %v1086_v55, 4  ;;  %v1089_v61 = vrot.slane %v3835_v54, 5  ;;  %v1796_v4 = vunpack.c.l.b16 %v1087_v63  ;;  %v1664_v7 = vsel %vm3653_vm11, %v1662_v60, %v1663_v47  ;;  %v3876_v63 = vld [vmem:[#allocation2 + $0x50] sm:$0x1] }
  0xd6   : > { %v1892_v1 = vpack.c.b16 %v1879_v59, %v1878_v57  ;;  %v1483_v8 = vshrl.u32 %v1414_v50, 16  ;;  %v1486_v9 = vshll.u32 %v1414_v50, 16  ;;  %v2043_v12 = vunpack.c.l.b16 %v1664_v7  ;;  %v3872_v50 = vld [vmem:[#allocation2 + $0x4c] sm:$0xf]  ;;  %v1021_v7 = vld [vmem:[#allocation2 + $0x54] sm:$0xe] }
  0xd7   : > { %v1090_v14 = vsel %vm3653_vm11, %v1088_v3, %v1089_v61  ;;  %v1492_v5 = vshll.u32 %v3810_v16, 16  ;;  %v1496_v13 = vshrl.u32 %v3810_v16, 16  ;;  %v1502_v22 = vshll.u32 %v3812_v17, 16 }
  0xd8   : > { %2026 = vrot.lane.b32.xlu1 %v2018_v51, %s3336_s27  ;;  %v1797_v18 = vunpack.c.l.b16 %v1090_v14  ;;  %v1485_v19 = vrot.slane %v1483_v8, 4  ;;  %v1488_v20 = vrot.slane %v1486_v9, 5  ;;  %v2058_v24 = vpack.c.b16 %v2043_v12, %v2042_v62 }
  0xd9   : > { %1902 = vrot.lane.b32.xlu2 %v1892_v1, %s3333_s30  ;;  %v1494_v26 = vrot.slane %v1492_v5, 5  ;;  %v1498_v11 = vrot.slane %v1496_v13, 4  ;;  %v991_v27 = vshrl.u32 %v809_v10, 16  ;;  %v1504_v29 = vrot.slane %v1502_v22, 5  ;;  %v1119_v22 = vld [vmem:[#allocation2 + $0x60] sm:$0xf] }
  0xda   : > { %v3859_v16 = vpack.c.b16 %v1797_v18, %v1796_v4  ;;  %v1489_v28 = vor.u32 %v1488_v20, %v1485_v19  ;;  %v994_v30 = vshll.u32 %v809_v10, 16  ;;  %v1000_v21 = vshll.u32 %v3852_v15, 16 }
  0xdb   : > { %v1499_v31 = vor.u32 %v1498_v11, %v1494_v26  ;;  %v993_v49 = vrot.slane %v991_v27, 4  ;;  %v1004_v17 = vshrl.u32 %v3852_v15, 16  ;;  %v1010_v34 = vshll.u32 %v3856_v6, 16  ;;  %v3889_v11 = vld [vmem:[#allocation2 + $0x64] sm:$0xf] }
  0xdc   : > { %v1490_v25 = vrot.slane %v1489_v28, 4  ;;  %v996_v32 = vrot.slane %v994_v30, 5  ;;  %v943_v35 = vshrl.u32 %v805_v44, 16  ;;  %v1002_v39 = vrot.slane %v1000_v21, 5 }
  0xdd   : > { %1990 = vrot.lane.b32.xlu0 %v3059_v23, %s3334_s26  ;;  %v1500_v37 = vrot.slane %v1499_v31, 4  ;;  %v1006_v40 = vrot.slane %v1004_v17, 4  ;;  %v946_v41 = vshll.u32 %v805_v44, 16  ;;  %v1012_v46 = vrot.slane %v1010_v34, 5 }
  0xde   : > { %v1495_v43 = vsel %vm3666_vm14, %v1490_v25, %v1494_v26  ;;  %v997_v45 = vor.u32 %v996_v32, %v993_v49  ;;  %v945_v47 = vrot.slane %v943_v35, 4  ;;  %v952_v0 = vshll.u32 %v3825_v38, 16  ;;  %v1115_v25 = vld [vmem:[#allocation2 + $0x48] sm:$0xf] }
  0xdf   : > { %v1505_v51 = vsel %vm3666_vm14, %v1500_v37, %v1504_v29  ;;  %v2006_v52 = vunpack.c.l.b16 %v1495_v43  ;;  %v1007_v53 = vor.u32 %v1006_v40, %v1002_v39  ;;  %v948_v55 = vrot.slane %v946_v41, 5  ;;  %v3056_v41 = vld [vmem:[#allocation2 + $0x60] sm:$0xff] }
  0xe0   : > { %2070 = vrot.lane.b32.xlu1 %v2060_v58, %s3337_s17  ;;  %v2007_v56 = vunpack.c.l.b16 %v1505_v51  ;;  %v998_v57 = vrot.slane %v997_v45, 4  ;;  %v956_v48 = vshrl.u32 %v3825_v38, 16  ;;  %v962_v62 = vshll.u32 %v3835_v54, 16 }
  0xe1   : > { %1986 = vrot.lane.b32.xlu2 %v3057_v36, %s3334_s26  ;;  %v1008_v59 = vrot.slane %v1007_v53, 4  ;;  %v949_v60 = vor.u32 %v948_v55, %v945_v47  ;;  %v2885_v3 = vrot.slane %v1326_v42, 9  ;;  %v954_v4 = vrot.slane %v952_v0, 5 }
  0xe2   : > { %v2020_v61 = vpack.c.b16 %v2007_v56, %v2006_v52  ;;  %v1003_v58 = vsel %vm3666_vm14, %v998_v57, %v1002_v39  ;;  %v958_v1 = vrot.slane %v956_v48, 4  ;;  %v964_v10 = vrot.slane %v962_v62, 5  ;;  %v1420_v48 = vld [vmem:[#allocation2 + $0x54] sm:$0xf] }
  0xe3   : > { %v1013_v38 = vsel %vm3666_vm14, %v1008_v59, %v1012_v46  ;;  %v1760_v8 = vunpack.c.l.b16 %v1003_v58  ;;  %v950_v9 = vrot.slane %v949_v60, 4  ;;  %v1390_v54 = vrot.slane %v3872_v50, 5 }
  0xe4   : > { %v1761_v12 = vunpack.c.l.b16 %v1013_v38  ;;  %v959_v14 = vor.u32 %v958_v1, %v954_v4  ;;  %v1393_v5 = vrot.slane %v3876_v63, 5  ;;  %v2879_v18 = vrot.slane %v1021_v7, 9  ;;  %v3918_v38 = vld [vmem:[#allocation2 + $0x5c] sm:$0x1] }
  0xe5   : > { %2066 = vrot.lane.b32.xlu0 %v2058_v24, %s3337_s17  ;;  %v955_v13 = vsel %vm3666_vm14, %v950_v9, %v954_v4  ;;  %v1100_v19 = vrot.slane %v3852_v15, 5  ;;  %v1103_v20 = vrot.slane %v3856_v6, 5  ;;  %v1391_v44 = vsel %vm3653_vm11, %v2885_v3, %v1390_v54  ;;  %v3899_v6 = vld [vmem:[#allocation2 + $0x68] sm:$0x1] }
  0xe6   : > { %v1769_v23 = vpack.c.b16 %v1761_v12, %v1760_v8  ;;  %v960_v26 = vrot.slane %v959_v14, 4  ;;  %v1756_v27 = vunpack.c.l.b16 %v955_v13  ;;  %v1392_v28 = vrot.slane %v1390_v54, 4  ;;  %v3923_v13 = vpop.permute.xlu2 %1866 }
  0xe7   : > { %v1102_v29 = vrot.slane %v1100_v19, 4  ;;  %v1101_v15 = vsel %vm3653_vm11, %v2879_v18, %v1100_v19  ;;  %v1298_v30 = vshrl.u32 %v1119_v22, 16  ;;  %v1301_v31 = vshll.u32 %v1119_v22, 16 }
  0xe8   : > { %1820 = vrot.lane.b32.xlu1 %v3859_v16, %s3331_s9  ;;  %v965_v24 = vsel %vm3666_vm14, %v960_v26, %v964_v10  ;;  %v1394_v21 = vsel %vm3653_vm11, %v1392_v28, %v1393_v5  ;;  %v1307_v16 = vshll.u32 %v3889_v11, 16  ;;  %v1924_v32 = vunpack.c.l.b16 %v1391_v44 }
  0xe9   : > { %2030 = vrot.lane.b32.xlu2 %v2020_v61, %s3336_s27  ;;  %v1757_v49 = vunpack.c.l.b16 %v965_v24  ;;  %v1104_v17 = vsel %vm3653_vm11, %v1102_v29, %v1103_v20  ;;  %v1300_v34 = vrot.slane %v1298_v30, 4  ;;  %v1303_v35 = vrot.slane %v1301_v31, 5  ;;  %v3913_v61 = vld [vmem:[#allocation2 + $0x58] sm:$0xf]  ;;  %v801_v31 = vld [vmem:[#allocation2 + $0x24] sm:$0xf] }
  0xea   : > { %v1800_v36 = vunpack.c.l.b16 %v1101_v15  ;;  %v1309_v37 = vrot.slane %v1307_v16, 5  ;;  %v1311_v39 = vshrl.u32 %v3889_v11, 16  ;;  %v1317_v40 = vshll.u32 %v3899_v6, 16 }
  0xeb   : > { %v1925_v43 = vunpack.c.l.b16 %v1394_v21  ;;  %v1801_v45 = vunpack.c.l.b16 %v1104_v17  ;;  %v1304_v46 = vor.u32 %v1303_v35, %v1300_v34  ;;  %v1250_v47 = vshrl.u32 %v1115_v25, 16 }
  0xec   : > { %v1767_v42 = vpack.c.b16 %v1757_v49, %v1756_v27  ;;  %v1313_v51 = vrot.slane %v1311_v39, 4  ;;  %v1253_v52 = vshll.u32 %v1115_v25, 16  ;;  %v1259_v53 = vshll.u32 %v3872_v50, 16  ;;  %v3931_v49 = vld [vmem:[#allocation2 + $0x28] sm:$0xf] }
  0xed   : > { %1784 = vrot.lane.b32.xlu0 %v1769_v23, %s3332_s10  ;;  %v1305_v55 = vrot.slane %v1304_v46, 4  ;;  %v1252_v56 = vrot.slane %v1250_v47, 4  ;;  %v1263_v57 = vshrl.u32 %v3872_v50, 16  ;;  %v1269_v0 = vshll.u32 %v3876_v63, 16  ;;  %v3054_v50 = vld [vmem:[#allocation2 + $0x48] sm:$0xff] }
  0xee   : > { %v1314_v59 = vor.u32 %v1313_v51, %v1309_v37  ;;  %v1319_v60 = vrot.slane %v1317_v40, 5  ;;  %v1255_v62 = vrot.slane %v1253_v52, 5  ;;  %v1261_v3 = vrot.slane %v1259_v53, 5  ;;  %v1328_v23 = vld [vmem:[#allocation2 + $0x60] sm:$0xe]  ;;  %v3064_v52 = vld [vmem:[#allocation2 + $0x6c] sm:$0xff] }
  0xef   : > { %v1935_v58 = vpack.c.b16 %v1925_v43, %v1924_v32  ;;  %v1809_v4 = vpack.c.b16 %v1801_v45, %v1800_v36  ;;  %v1310_v1 = vsel %vm3666_vm14, %v1305_v55, %v1309_v37  ;;  %v1265_v7 = vrot.slane %v1263_v57, 4 }
  0xf0   : > { %1872 = vrot.lane.b32.xlu1 %v3056_v41, %s3330_s13  ;;  %v1315_v63 = vrot.slane %v1314_v59, 4  ;;  %v1256_v8 = vor.u32 %v1255_v62, %v1252_v56  ;;  %v1271_v9 = vrot.slane %v1269_v0, 5  ;;  %v1555_v10 = vshrl.u32 %v1420_v48, 16  ;;  %v1017_v59 = vld [vmem:[#allocation2 + $0x24] sm:$0xe]  ;;  %v3950_v62 = vpop.permute.xlu2 %1870 }
  0xf1   : > { %1780 = vrot.lane.b32.xlu2 %v1767_v42, %s3332_s10  ;;  %v1266_v12 = vor.u32 %v1265_v7, %v1261_v3  ;;  %v1558_v14 = vshll.u32 %v1420_v48, 16  ;;  %v1564_v54 = vshll.u32 %v3913_v61, 16  ;;  %v1568_v5 = vshrl.u32 %v3913_v61, 16  ;;  %v814_v42 = vld [vmem:[#allocation2 + $0x2c] sm:$0x1] }
  0xf2   : > { %v1320_v18 = vsel %vm3666_vm14, %v1315_v63, %v1319_v60  ;;  %v1257_v19 = vrot.slane %v1256_v8, 4  ;;  %v1557_v20 = vrot.slane %v1555_v10, 4  ;;  %v1574_v22 = vshll.u32 %v3918_v38, 16  ;;  %v797_v60 = vld [vmem:[#allocation2 + $0xc] sm:$0xf] }
  0xf3   : > { %v1888_v26 = vunpack.c.l.b16 %v1310_v1  ;;  %v1267_v27 = vrot.slane %v1266_v12, 4  ;;  %v1560_v44 = vrot.slane %v1558_v14, 5  ;;  %v1566_v28 = vrot.slane %v1564_v54, 5 }
  0xf4   : > { %v1889_v29 = vunpack.c.l.b16 %v1320_v18  ;;  %v1262_v24 = vsel %vm3666_vm14, %v1257_v19, %v1261_v3  ;;  %v1570_v15 = vrot.slane %v1568_v5, 4  ;;  %v1576_v30 = vrot.slane %v1574_v22, 5  ;;  %v812_v22 = vld [vmem:[#allocation2 + $0x14] sm:$0x1] }
  0xf5   : > { %1868 = vrot.lane.b32.xlu0 %v3054_v50, %s3330_s13  ;;  %v1272_v21 = vsel %vm3666_vm14, %v1267_v27, %v1271_v9  ;;  %v1884_v17 = vunpack.c.l.b16 %v1262_v24  ;;  %v1561_v16 = vor.u32 %v1560_v44, %v1557_v20  ;;  %v2887_v25 = vrot.slane %v1328_v23, 9  ;;  %v798_v9 = vld [vmem:[#allocation2 + $0x10] sm:$0xf] }
  0xf6   : > { %v1885_v32 = vunpack.c.l.b16 %v1272_v21  ;;  %v1571_v34 = vor.u32 %v1570_v15, %v1566_v28  ;;  %v1404_v35 = vrot.slane %v3889_v11, 5  ;;  %v1407_v36 = vrot.slane %v3899_v6, 5 }
  0xf7   : > { %v1562_v37 = vrot.slane %v1561_v16, 4  ;;  %v895_v39 = vshrl.u32 %v801_v31, 16  ;;  %v898_v40 = vshll.u32 %v801_v31, 16  ;;  %v904_v41 = vshll.u32 %v3931_v49, 16  ;;  %v1015_v31 = vld [vmem:[#allocation2 + $0xc] sm:$0xe] }
  0xf8   : > { %1948 = vrot.lane.b32.xlu1 %v1935_v58, %s3335_s14  ;;  %v1897_v43 = vpack.c.b16 %v1889_v29, %v1888_v26  ;;  %v1572_v45 = vrot.slane %v1571_v34, 4  ;;  %v1406_v46 = vrot.slane %v1404_v35, 4  ;;  %v1405_v53 = vsel %vm3653_vm11, %v2887_v25, %v1404_v35  ;;  %v3062_v26 = vld [vmem:[#allocation2 + $0x54] sm:$0xff]  ;;  %v1424_v25 = vld [vmem:[#allocation2 + $0x6c] sm:$0xf] }
  0xf9   : > { %1824 = vrot.lane.b32.xlu2 %v1809_v4, %s3331_s9  ;;  %v1567_v47 = vsel %vm3666_vm14, %v1562_v37, %v1566_v28  ;;  %v897_v51 = vrot.slane %v895_v39, 4  ;;  %v900_v11 = vrot.slane %v898_v40, 5  ;;  %v1895_v56 = vpack.c.b16 %v1885_v32, %v1884_v17 }
  0xfa   : > { %v1577_v6 = vsel %vm3666_vm14, %v1572_v45, %v1576_v30  ;;  %v1408_v55 = vsel %vm3653_vm11, %v1406_v46, %v1407_v36  ;;  %v906_v0 = vrot.slane %v904_v41, 5  ;;  %v908_v48 = vshrl.u32 %v3931_v49, 16 }
  0xfb   : > { %v901_v57 = vor.u32 %v900_v11, %v897_v51  ;;  %v2012_v3 = vunpack.c.l.b16 %v1567_v47  ;;  %v2013_v58 = vunpack.c.l.b16 %v1577_v6  ;;  %v914_v4 = vshll.u32 %v814_v42, 16 }
  0xfc   : > { %v1072_v1 = vrot.slane %v3931_v49, 5  ;;  %v1928_v7 = vunpack.c.l.b16 %v1405_v53  ;;  %v1929_v50 = vunpack.c.l.b16 %v1408_v55  ;;  %v910_v8 = vrot.slane %v908_v48, 4  ;;  %v1433_v48 = vld [vmem:[#allocation2 + $0x74] sm:$0x1] }
  0xfd   : > { %1912 = vrot.lane.b32.xlu0 %v1897_v43, %s3333_s30  ;;  %v902_v63 = vrot.slane %v901_v57, 4  ;;  %v916_v10 = vrot.slane %v914_v4, 5  ;;  %v2875_v12 = vrot.slane %v1017_v59, 9  ;;  %v1075_v14 = vrot.slane %v814_v42, 5 }
  0xfe   : > { %v847_v54 = vshrl.u32 %v797_v60, 16  ;;  %v911_v19 = vor.u32 %v910_v8, %v906_v0  ;;  %v1074_v20 = vrot.slane %v1072_v1, 4  ;;  %v850_v23 = vshll.u32 %v797_v60, 16 }
  0xff   : > { %v907_v18 = vsel %vm3666_vm14, %v902_v63, %v906_v0  ;;  %v2023_v27 = vpack.c.b16 %v2013_v58, %v2012_v3  ;;  %v856_v28 = vshll.u32 %v798_v9, 16  ;;  %v1937_v29 = vpack.c.b16 %v1929_v50, %v1928_v7  ;;  %v1425_v0 = vld [vmem:[#allocation2 + $0x70] sm:$0xf] }
 0x100   : > { %2000 = vrot.lane.b32.xlu1 %v3064_v52, %s3334_s26  ;;  %v3954_v5 = vpop.permute.xlu1 %1818  ;;  %v849_v44 = vrot.slane %v847_v54, 4  ;;  %v912_v24 = vrot.slane %v911_v19, 4  ;;  %v852_v15 = vrot.slane %v850_v23, 5  ;;  %v860_v30 = vshrl.u32 %v798_v9, 16 }
 0x101   : > { %1908 = vrot.lane.b32.xlu2 %v1895_v56, %s3333_s30  ;;  %v1752_v49 = vunpack.c.l.b16 %v907_v18  ;;  %v1073_v21 = vsel %vm3653_vm11, %v2875_v12, %v1072_v1  ;;  %v858_v17 = vrot.slane %v856_v28, 5  ;;  %v866_v16 = vshll.u32 %v812_v22, 16  ;;  %v1111_v18 = vld [vmem:[#allocation2 + $0x30] sm:$0xf] }
 0x102   : > { %v917_v32 = vsel %vm3666_vm14, %v912_v24, %v916_v10  ;;  %v1076_v34 = vsel %vm3653_vm11, %v1074_v20, %v1075_v14  ;;  %v853_v35 = vor.u32 %v852_v15, %v849_v44  ;;  %v862_v36 = vrot.slane %v860_v30, 4  ;;  %v1633_v10 = vld [vmem:[#allocation2 + $0x6c] sm:$0xe] }
 0x103   : > { %v1753_v37 = vunpack.c.l.b16 %v917_v32  ;;  %v868_v39 = vrot.slane %v866_v16, 5  ;;  %v2873_v40 = vrot.slane %v1015_v31, 9  ;;  %v1058_v41 = vrot.slane %v798_v9, 5 }
 0x104   : > { %v854_v43 = vrot.slane %v853_v35, 4  ;;  %v863_v45 = vor.u32 %v862_v36, %v858_v17  ;;  %v1061_v46 = vrot.slane %v812_v22, 5  ;;  %v1603_v47 = vshrl.u32 %v1424_v25, 16  ;;  %v3995_v35 = vld [vmem:[#allocation2 + $0x38] sm:$0x1] }
 0x105   : > { %1996 = vrot.lane.b32.xlu0 %v3062_v26, %s3334_s26  ;;  %v3968_v51 = vpop.permute.xlu2 %1946  ;;  %v1060_v11 = vrot.slane %v1058_v41, 4  ;;  %v1606_v52 = vshll.u32 %v1424_v25, 16  ;;  %v1792_v53 = vunpack.c.l.b16 %v1073_v21  ;;  %v1793_v55 = vunpack.c.l.b16 %v1076_v34 }
 0x106   : > { %v859_v56 = vsel %vm3666_vm14, %v854_v43, %v858_v17  ;;  %v864_v57 = vrot.slane %v863_v45, 4  ;;  %v1765_v59 = vpack.c.b16 %v1753_v37, %v1752_v49  ;;  %v1059_v3 = vsel %vm3653_vm11, %v2873_v40, %v1058_v41  ;;  %v3988_v17 = vld [vmem:[#allocation2 + $0x34] sm:$0xf]  ;;  %v2234_v43 = vld [vmem:[%s4390_s3 + $0x20] sm:$0xf] }
 0x107   : > { %v3966_v42 = vpop.permute.xlu0 %1778  ;;  %v1748_v60 = vunpack.c.l.b16 %v859_v56  ;;  %v1605_v58 = vrot.slane %v1603_v47, 4  ;;  %v1062_v1 = vsel %vm3653_vm11, %v1060_v11, %v1061_v46  ;;  %v1608_v7 = vrot.slane %v1606_v52, 5  ;;  %v3050_v47 = vld [vmem:[#allocation2 + $0x18] sm:$0xff]  ;;  %v1631_v56 = vld [vmem:[#allocation2 + $0x54] sm:$0xe] }
 0x108   : > { %2036 = vrot.lane.b32.xlu1 %v2023_v27, %s3336_s27  ;;  %v3971_v6 = vpop.permute.xlu1 %1822  ;;  %v869_v4 = vsel %vm3666_vm14, %v864_v57, %v868_v39  ;;  %v1612_v63 = vshll.u32 %v1425_v0, 16  ;;  %v1616_v8 = vshrl.u32 %v1425_v0, 16  ;;  %v1622_v9 = vshll.u32 %v1433_v48, 16  ;;  %v3045_v57 = vld [vmem:[#allocation2 + $0x30] sm:$0xff] }
 0x109   : > { %1952 = vrot.lane.b32.xlu2 %v1937_v29, %s3335_s14  ;;  %v1749_v50 = vunpack.c.l.b16 %v869_v4  ;;  %v1805_v12 = vpack.c.b16 %v1793_v55, %v1792_v53  ;;  %v1788_v14 = vunpack.c.l.b16 %v1059_v3  ;;  %v1609_v54 = vor.u32 %v1608_v7, %v1605_v58  ;;  %v1107_v3 = vld [vmem:[#allocation2 + $0x18] sm:$0xf] }
 0x10a   : > { %v1789_v20 = vunpack.c.l.b16 %v1062_v1  ;;  %v1614_v22 = vrot.slane %v1612_v63, 5  ;;  %v1618_v23 = vrot.slane %v1616_v8, 4  ;;  %v1624_v27 = vrot.slane %v1622_v9, 5 }
 0x10b   : > { %v1763_v19 = vpack.c.b16 %v1749_v50, %v1748_v60  ;;  %v1610_v26 = vrot.slane %v1609_v54, 4  ;;  %v2895_v44 = vrot.slane %v1633_v10, 9  ;;  %v1709_v28 = vrot.slane %v1425_v0, 5  ;;  %v3047_v10 = vld [vmem:[#allocation2 + $0x48] sm:$0xff] }
 0x10c   : > { %v1619_v24 = vor.u32 %v1618_v23, %v1614_v22  ;;  %v1712_v15 = vrot.slane %v1433_v48, 5  ;;  %v1202_v30 = vshrl.u32 %v1111_v18, 16  ;;  %v1205_v31 = vshll.u32 %v1111_v18, 16  ;;  %v4017_v18 = vld [vmem:[#allocation2 + $0x1c] sm:$0xf] }
 0x10d   : > { %1776 = vrot.lane.b32.xlu0 %v1765_v59, %s3332_s10  ;;  %v1615_v49 = vsel %vm3666_vm14, %v1610_v26, %v1614_v22  ;;  %v1711_v21 = vrot.slane %v1709_v28, 4  ;;  %v3991_v16 = vpop.permute.xlu2 %1998  ;;  %v1803_v25 = vpack.c.b16 %v1789_v20, %v1788_v14  ;;  %v1710_v34 = vsel %vm3653_vm11, %v2895_v44, %v1709_v28  ;;  %v4025_v26 = vld [vmem:[#allocation2 + $0x20] sm:$0x1] }
 0x10e   : > { %v1620_v32 = vrot.slane %v1619_v24, 4  ;;  %v2016_v37 = vunpack.c.l.b16 %v1615_v49  ;;  %v1204_v40 = vrot.slane %v1202_v30, 4  ;;  %v1207_v41 = vrot.slane %v1205_v31, 5 }
 0x10f   : > { %v3983_v29 = vpop.permute.xlu0 %1782  ;;  %v1713_v39 = vsel %vm3653_vm11, %v1711_v21, %v1712_v15  ;;  %vm2082_vm15 = vcmask 64512   ;;  %vm2107_vm0 = vcmask 130048   ;;  %v1211_v46 = vshll.u32 %v3988_v17, 16 }
 0x110   : > { %1816 = vrot.lane.b32.xlu1 %v1805_v12, %s3331_s9  ;;  %v1625_v45 = vsel %vm3666_vm14, %v1620_v32, %v1624_v27  ;;  %v1208_v52 = vor.u32 %v1207_v41, %v1204_v40  ;;  %v1215_v53 = vshrl.u32 %v3988_v17, 16  ;;  %v1221_v55 = vshll.u32 %v3995_v35, 16 }
 0x111   : > { %1772 = vrot.lane.b32.xlu2 %v1763_v19, %s3332_s10  ;;  %v3997_v36 = vpop.permute.xlu1 %1910  ;;  %v2017_v11 = vunpack.c.l.b16 %v1625_v45  ;;  %v2056_v0 = vunpack.c.l.b16 %v1710_v34  ;;  %v2057_v48 = vunpack.c.l.b16 %v1713_v39  ;;  %v1213_v59 = vrot.slane %v1211_v46, 5 }
 0x112   : > { %v2256_v60 = vunpack.c.l.b16 %v2234_v43  ;;  %v1209_v4 = vrot.slane %v1208_v52, 4  ;;  %v1217_v1 = vrot.slane %v1215_v53, 4  ;;  %vm2283_vm1 = vcmask 1043456   ;;  %v1416_v53 = vld [vmem:[#allocation2 + $0x3c] sm:$0xf] }
 0x113   : > { %v2025_v58 = vpack.c.b16 %v2017_v11, %v2016_v37  ;;  %v1223_v50 = vrot.slane %v1221_v55, 5  ;;  %v2893_v8 = vrot.slane %v1631_v56, 9  ;;  %v1695_v9 = vrot.slane %v3913_v61, 5 }
 0x114   : > { %v2261_v63 = vpack.c.b16 %v2256_v60, %v2256_v60  ;;  %v1214_v12 = vsel %vm3666_vm14, %v1209_v4, %v1213_v59  ;;  %v1218_v14 = vor.u32 %v1217_v1, %v1213_v59  ;;  %v1698_v54 = vrot.slane %v3918_v38, 5 }
 0x115   : > { %1812 = vrot.lane.b32.xlu0 %v1803_v25, %s3331_s9  ;;  %v1154_v19 = vshrl.u32 %v1107_v3, 16  ;;  %v2097_v20 = vsel %vm2082_vm15, %v3045_v57, %v3966_v42  ;;  %v2065_v22 = vpack.c.b16 %v2057_v48, %v2056_v0  ;;  %v1696_v23 = vsel %vm3653_vm11, %v2893_v8, %v1695_v9  ;;  %v3068_v42 = vld [vmem:[%s4390_s3 + $0x18] sm:$0xff]  ;;  %v1324_v25 = vld [vmem:[#allocation2 + $0x30] sm:$0xe]  ;;  %v4052_v48 = vld [vmem:[#allocation2 + $0x40] sm:$0xf] }
 0x116   : > { %v2285_v61 = vsel %vm2283_vm1, %v2261_v63, 0  ;;  %v1219_v44 = vrot.slane %v1218_v14, 4  ;;  %v1880_v38 = vunpack.c.l.b16 %v1214_v12  ;;  %v1697_v28 = vrot.slane %v1695_v9, 4 }
 0x117   : > { %v4010_v7 = vpop.permute.xlu0 %1906  ;;  %3072 = vmatpush.bf16.msra.mxu3 %v2285_v61  ;;  %v2052_v24 = vunpack.c.l.b16 %v1696_v23  ;;  %3071 = vmatpush.bf16.msra.mxu2 %v2285_v61  ;;  %v1156_v30 = vrot.slane %v1154_v19, 4  ;;  %v1157_v31 = vshll.u32 %v1107_v3, 16  ;;  %v1163_v49 = vshll.u32 %v4017_v18, 16 }
 0x118   : > { %1860 = vrot.lane.b32.xlu1 %v3050_v47, %s3330_s13  ;;  %v1167_v21 = vshrl.u32 %v4017_v18, 16  ;;  %3070 = vmatpush.bf16.msra.mxu1 %v2285_v61  ;;  %v2103_v32 = vsel %vm2082_vm15, %v3047_v10, %v3983_v29  ;;  %v1224_v34 = vsel %vm3666_vm14, %v1219_v44, %v1223_v50  ;;  %v1699_v37 = vsel %vm3653_vm11, %v1697_v28, %v1698_v54  ;;  %v3067_v29 = vld [vmem:[%s4390_s3 + $0x10] sm:$0xff]  ;;  %v4079_v54 = vld [vmem:[#allocation2 + $0x44] sm:$0x1] }
 0x119   : > { %2040 = vrot.lane.b32.xlu2 %v2025_v58, %s3336_s27  ;;  %v4027_v27 = vpop.permute.xlu1 %1994  ;;  %2290 = vmatpush.bf16.msra.mxu0 %v2285_v61  ;;  %v1173_v39 = vshll.u32 %v4025_v26, 16  ;;  %v1881_v40 = vunpack.c.l.b16 %v1224_v34  ;;  %v2053_v41 = vunpack.c.l.b16 %v1699_v37  ;;  %v1159_v43 = vrot.slane %v1157_v31, 5 }
 0x11a   : > { %v1165_v45 = vrot.slane %v1163_v49, 5  ;;  %v2117_v46 = vsel %vm2107_vm0, %v2097_v20, %v3954_v5  ;;  %v1169_v47 = vrot.slane %v1167_v21, 4  ;;  %v2883_v11 = vrot.slane %v1324_v25, 9  ;;  %v1412_v20 = vld [vmem:[#allocation2 + $0x24] sm:$0xf] }
 0x11b   : > { %v4032_v15 = vpop.permute.xlu2 %2034  ;;  %3075 = vmatpush.bf16.msra.mxu3 %v3068_v42  ;;  %3074 = vmatpush.bf16.msra.mxu2 %v3068_v42  ;;  %v1376_v52 = vrot.slane %v3988_v17, 5  ;;  %vm2124_vm2 = vcmask 195584   ;;  %v1893_v56 = vpack.c.b16 %v1881_v40, %v1880_v38  ;;  %v2063_v57 = vpack.c.b16 %v2053_v41, %v2052_v24  ;;  %v3058_v38 = vld [vmem:[#allocation2 + $0x24] sm:$0xff]  ;;  %v4095_v40 = vld [vmem:[#allocation2 + $0x2c] sm:$0x1] }
 0x11c   : > { %v1160_v0 = vor.u32 %v1159_v43, %v1156_v30  ;;  %3073 = vmatpush.bf16.msra.mxu1 %v3068_v42  ;;  %v2121_v5 = vsel %vm2107_vm0, %v2103_v32, %v3971_v6  ;;  %v1170_v59 = vor.u32 %v1169_v47, %v1165_v45  ;;  %v1175_v60 = vrot.slane %v1173_v39, 5  ;;  %v3066_v6 = vld [vmem:[%s4390_s3 + $0x8] sm:$0xff]  ;;  %v3052_v30 = vld [vmem:[#allocation2 + $0x30] sm:$0xff]  ;;  %v3065_v21 = vld [vmem:[%s4390_s3] sm:$0xff] }
 0x11d   : > { %2080 = vrot.lane.b32.xlu0 %v2065_v22, %s3337_s17  ;;  %2291 = vmatpush.bf16.msra.mxu0 %v3068_v42  ;;  %v1379_v3 = vrot.slane %v3995_v35, 5  ;;  %v4061_v58 = vsel %vm3653_vm11, %v2883_v11, %v1376_v52  ;;  %v1378_v4 = vrot.slane %v1376_v52, 4  ;;  %v1507_v1 = vshrl.u32 %v1416_v53, 16 }
 0x11e   : > { %v1161_v17 = vrot.slane %v1160_v0, 4  ;;  %vm2141_vm3 = vcmask 261120   ;;  %v1171_v63 = vrot.slane %v1170_v59, 4  ;;  %v1510_v35 = vshll.u32 %v1416_v53, 16 }
 0x11f   : > { %v4050_v55 = vpop.permute.xlu0 %1950  ;;  %3078 = vmatpush.bf16.msra.mxu3 %v3067_v29  ;;  %3077 = vmatpush.bf16.msra.mxu2 %v3067_v29  ;;  %v1516_v8 = vshll.u32 %v4052_v48, 16  ;;  %v2138_v9 = vsel %vm2124_vm2, %v2121_v5, %v3950_v62  ;;  %v4073_v10 = vsel %vm2124_vm2, %v2117_v46, %v3923_v13  ;;  %v1509_v19 = vrot.slane %v1507_v1, 4  ;;  %v4084_v13 = vld [vmem:[#allocation2 + $0x28] sm:$0xf] }
 0x120   : > { %1904 = vrot.lane.b32.xlu1 %v1893_v56, %s3333_s30  ;;  %v1166_v14 = vsel %vm3666_vm14, %v1161_v17, %v1165_v45  ;;  %3076 = vmatpush.bf16.msra.mxu1 %v3067_v29  ;;  %v1176_v22 = vsel %vm3666_vm14, %v1171_v63, %v1175_v60  ;;  %v1920_v62 = vunpack.c.l.b16 %v4061_v58  ;;  %v1512_v23 = vrot.slane %v1510_v35, 5  ;;  %v1322_v58 = vld [vmem:[#allocation2 + $0x18] sm:$0xe] }
 0x121   : > { %2076 = vrot.lane.b32.xlu2 %v2063_v57, %s3337_s17  ;;  %v4063_v50 = vpop.permute.xlu1 %1774  ;;  %2292 = vmatpush.bf16.msra.mxu0 %v3067_v29  ;;  %v1876_v61 = vunpack.c.l.b16 %v1166_v14  ;;  %v1877_v44 = vunpack.c.l.b16 %v1176_v22  ;;  %v1380_v28 = vsel %vm3653_vm11, %v1378_v4, %v1379_v3  ;;  %v1518_v24 = vrot.slane %v1516_v8, 5 }
 0x122   : > { %v1520_v42 = vshrl.u32 %v4052_v48, 16  ;;  %v1513_v31 = vor.u32 %v1512_v23, %v1509_v19  ;;  %v1526_v49 = vshll.u32 %v4079_v54, 16  ;;  %v1459_v25 = vshrl.u32 %v1412_v20, 16 }
 0x123   : > { %v4075_v12 = vpop.permute.xlu2 %1814  ;;  %3081 = vmatpush.bf16.msra.mxu3 %v3066_v6  ;;  %3080 = vmatpush.bf16.msra.mxu2 %v3066_v6  ;;  %v1462_v32 = vshll.u32 %v1412_v20, 16  ;;  %v1891_v34 = vpack.c.b16 %v1877_v44, %v1876_v61  ;;  %v1468_v41 = vshll.u32 %v4084_v13, 16  ;;  %v1472_v43 = vshrl.u32 %v4084_v13, 16  ;;  %v1629_v20 = vld [vmem:[#allocation2 + $0x3c] sm:$0xe] }
 0x124   : > { %v1522_v39 = vrot.slane %v1520_v42, 4  ;;  %3079 = vmatpush.bf16.msra.mxu1 %v3066_v6  ;;  %v1921_v45 = vunpack.c.l.b16 %v1380_v28  ;;  %v1514_v46 = vrot.slane %v1513_v31, 4  ;;  %v1528_v47 = vrot.slane %v1526_v49, 5 }
 0x125   : > { %2293 = vmatpush.bf16.msra.mxu0 %v3066_v6  ;;  %v1461_v29 = vrot.slane %v1459_v25, 4  ;;  %1900 = vrot.lane.b32.xlu0 %v1891_v34, %s3333_s30  ;;  %v1464_v52 = vrot.slane %v1462_v32, 5  ;;  %v1470_v53 = vrot.slane %v1468_v41, 5  ;;  %v1474_v56 = vrot.slane %v1472_v43, 4 }
 0x126   : > { %v1523_v11 = vor.u32 %v1522_v39, %v1518_v24  ;;  %vm2158_vm4 = vcmask 326656   ;;  %vm2175_vm5 = vcmask 392192   ;;  %v1519_v0 = vsel %vm3666_vm14, %v1514_v46, %v1518_v24 }
 0x127   : > { %v4093_v37 = vpop.permute.xlu0 %1770  ;;  %3084 = vmatpush.bf16.msra.mxu3 %v3065_v21  ;;  %v1478_v5 = vshll.u32 %v4095_v40, 16  ;;  %v2155_v59 = vsel %vm2141_vm3, %v2138_v9, %v3997_v36  ;;  %vm2192_vm6 = vcmask 457728   ;;  %v1465_v17 = vor.u32 %v1464_v52, %v1461_v29  ;;  %3083 = vmatpush.bf16.msra.mxu2 %v3065_v21  ;;  %v1627_v29 = vld [vmem:[#allocation2 + $0x24] sm:$0xe] }
 0x128   : > { %1988 = vrot.lane.b32.xlu1 %v3058_v38, %s3334_s26  ;;  %v1524_v3 = vrot.slane %v1523_v11, 4  ;;  %3082 = vmatpush.bf16.msra.mxu1 %v3065_v21  ;;  %v2172_v4 = vsel %vm2158_vm4, %v2155_v59, %v4050_v55  ;;  %v2008_v1 = vunpack.c.l.b16 %v1519_v0  ;;  %v1475_v63 = vor.u32 %v1474_v56, %v1470_v53 }
 0x129   : > { %1864 = vrot.lane.b32.xlu2 %v3052_v30, %s3330_s13  ;;  %v4102_v57 = vpop.permute.xlu1 %1810  ;;  %v1480_v6 = vrot.slane %v1478_v5, 5  ;;  %2294 = vmatpush.bf16.msra.mxu0 %v3065_v21  ;;  %v1933_v35 = vpack.c.b16 %v1921_v45, %v1920_v62  ;;  %v1466_v36 = vrot.slane %v1465_v17, 4  ;;  %v1681_v9 = vrot.slane %v4052_v48, 5  ;;  %s2690_s13 = scalar_lea.sflag [#allocation4], %s332_s12 }
 0x12a   : > { %v1529_v8 = vsel %vm3666_vm14, %v1524_v3, %v1528_v47  ;;  %v1476_v19 = vrot.slane %v1475_v63, 4  ;;  %v2881_v22 = vrot.slane %v1322_v58, 9  ;;  %v1362_v61 = vrot.slane %v4017_v18, 5  ;;  %v3060_v3 = vld [vmem:[#allocation2 + $0x3c] sm:$0xff] }
 0x12b   : > { %v4109_v60 = vpop.permute.xlu2 %1858  ;;  %v2009_v14 = vunpack.c.l.b16 %v1529_v8  ;;  %v2151_v55 = vsel %vm2141_vm3, %v4073_v10, %v4010_v7  ;;  %v2189_v23 = vsel %vm2175_vm5, %v2172_v4, %v3991_v16  ;;  %v1471_v44 = vsel %vm3666_vm14, %v1466_v36, %v1470_v53 }
 0x12c   : > { %vm2209_vm7 = vcmask 523264   ;;  %v1481_v48 = vsel %vm3666_vm14, %v1476_v19, %v1480_v6  ;;  %vm2266_vm8 = vcmask 588800   ;;  %v1365_v28 = vrot.slane %v4025_v26, 5  ;;  %v3043_v6 = vld [vmem:[#allocation2 + $0x18] sm:$0xff] }
 0x12d   : > { %v2021_v38 = vpack.c.b16 %v2009_v14, %v2008_v1  ;;  %1944 = vrot.lane.b32.xlu0 %v1933_v35, %s3335_s14  ;;  %v2004_v18 = vunpack.c.l.b16 %v1471_v44  ;;  %v2005_v24 = vunpack.c.l.b16 %v1481_v48  ;;  %v2891_v7 = vrot.slane %v1629_v20, 9 }
 0x12e   : > { %v1363_v16 = vsel %vm3653_vm11, %v2881_v22, %v1362_v61  ;;  %v1683_v30 = vrot.slane %v1681_v9, 4  ;;  %v1684_v33 = vrot.slane %v4079_v54, 5  ;;  %v1364_v31 = vrot.slane %v1362_v61, 4 }
 0x12f   : > { %v2039_v62 = vpop.permute.xlu0 %2038  ;;  %v2168_v26 = vsel %vm2158_vm4, %v2151_v55, %v3968_v51  ;;  %v1916_v25 = vunpack.c.l.b16 %v1363_v16  ;;  %v2019_v39 = vpack.c.b16 %v2005_v24, %v2004_v18  ;;  %v1682_v54 = vsel %vm3653_vm11, %v2891_v7, %v1681_v9  ;;  %v3041_v9 = vld [vmem:[#allocation2] sm:$0xff] }
 0x130   : > { %v2206_v10 = vsel %vm2192_vm6, %v2189_v23, %v2039_v62  ;;  %2032 = vrot.lane.b32.xlu1 %v2021_v38, %s3336_s27  ;;  %v2185_v32 = vsel %vm2175_vm5, %v2168_v26, %v4027_v27  ;;  %v1366_v34 = vsel %vm3653_vm11, %v1364_v31, %v1365_v28  ;;  %v1685_v51 = vsel %vm3653_vm11, %v1683_v30, %v1684_v33 }
 0x131   : > { %v2079_v42 = vpop.permute.xlu1 %2078  ;;  %v1917_v41 = vunpack.c.l.b16 %v1366_v34  ;;  %v2202_v43 = vsel %vm2192_vm6, %v2185_v32, %v4032_v15  ;;  %v1667_v27 = vrot.slane %v4084_v13, 5  ;;  %v2048_v11 = vunpack.c.l.b16 %v1682_v54 }
 0x132   : > { %v2223_v21 = vsel %vm2209_vm7, %v2206_v10, %v2079_v42  ;;  %v2049_v52 = vunpack.c.l.b16 %v1685_v51  ;;  %v2889_v0 = vrot.slane %v1627_v29, 9  ;;  %v1670_v15 = vrot.slane %v4095_v40, 5 }
 0x133   : > { %v1903_v49 = vpop.permute.xlu2 %1902  ;;  %3014 = vmatmul.msk.bf16.vlgmr.msra.gmra.mxu3 %vm2266_vm8, %v2223_v21  ;;  %v1931_v46 = vpack.c.b16 %v1917_v41, %v1916_v25  ;;  %v1669_v5 = vrot.slane %v1667_v27, 4  ;;  %v2091_v40 = vsel %vm2082_vm15, %v3043_v6, %v4063_v50  ;;  %v2085_v22 = vsel %vm2082_vm15, %v3041_v9, %v4093_v37  ;;  %v3046_v21 = vld [vmem:[#allocation2 + $0x3c] sm:$0xff] }
 0x134   : > { %v2061_v59 = vpack.c.b16 %v2049_v52, %v2048_v11  ;;  %v1668_v17 = vsel %vm3653_vm11, %v2889_v0, %v1667_v27  ;;  %v2113_v14 = vsel %vm2107_vm0, %v2091_v40, %v4075_v12  ;;  %v2109_v61 = vsel %vm2107_vm0, %v2085_v22, %v4102_v57  ;;  %v3048_v52 = vld [vmem:[#allocation2 + $0x54] sm:$0xff] }
 0x135   : > { %2028 = vrot.lane.b32.xlu0 %v2019_v39, %s3336_s27  ;;  %1940 = vrot.lane.b32.xlu2 %v1931_v46, %s3335_s14  ;;  %v1671_v58 = vsel %vm3653_vm11, %v1669_v5, %v1670_v15  ;;  %v2044_v1 = vunpack.c.l.b16 %v1668_v17  ;;  %v2126_v12 = vsel %vm2124_vm2, %v2109_v61, %v4109_v60  ;;  %vm2672_vm13 = vcmask 257024   ;;  %s3035_s14 = sshll.u32 %s3314_s22, 5 }
 0x136   : > { %v2045_v63 = vunpack.c.l.b16 %v1671_v58 }
 0x137   : > { %v2075_v45 = vpop.permute.xlu0 %2074 }
 0x138   : > { %v2219_v47 = vsel %vm2209_vm7, %v2202_v43, %v2075_v45  ;;  %v2059_v8 = vpack.c.b16 %v2045_v63, %v2044_v1 }
 0x139   : > { %3012 = vmatmul.msk.bf16.vlgmr.msra.gmra.mxu2 %vm2266_vm8, %v2219_v47 }
 0x13a   : > { %v1899_v53 = vpop.permute.xlu1 %1898 }
 0x13b   : > { %v1987_v56 = vpop.permute.xlu2 %1986  ;;  %v2143_v44 = vsel %vm2141_vm3, %v2126_v12, %v1899_v53 }
 0x13d   : > { %2072 = vrot.lane.b32.xlu0 %v2061_v59, %s3337_s17  ;;  %1992 = vrot.lane.b32.xlu2 %v3060_v3, %s3334_s26  ;;  %s3069_s26 = sshll.u32 %s3310_s21, 4 }
 0x13e   : > { %s2702_s27 = sadd.s32 %s3069_s26, %s3035_s14 }
 0x13f   : > { %v1863_v13 = vpop.permute.xlu0 %1862  ;;  %s3036_s21 = sshll.u32 %s2702_s27, 2 }
 0x140   : > { %v2130_v19 = vsel %vm2124_vm2, %v2113_v14, %v1863_v13  ;;  %s2704_s10 = scalar_lea.hbm %s4392_s5, %s3036_s21  ;;  %s3252_s21 = scalar_lea.hbm %s4392_s5, 256 }
 0x141   : > { %v2147_v55 = vsel %vm2141_vm3, %v2130_v19, %v1903_v49  ;;  %v3044_v19 = vld [vmem:[#allocation2 + $0x24] sm:$0xff]  ;;  %s2707_s8 = sshll.u32 %s2704_s10, 4  ;;  %s2708_s8 = int_to_ptr.hbm [resolvable:$true] %s2707_s8 }
 0x142   : > { %v1943_v4 = vpop.permute.xlu1 %1942  ;;  %s3246_s30 = sshra.s32 %s2708_s8, 4  ;;  %s3247_s30 = int_to_ptr.hbm [resolvable:$true] %s3246_s30 }
 0x143   : > { %v2031_v35 = vpop.permute.xlu2 %2030  ;;  %v2164_v50 = vsel %vm2158_vm4, %v2147_v55, %v1943_v4  ;;  %s3248_s26 = scalar_lea.hbm %s3247_s30, 64  ;;  %p3253_p12 = scmp.lt.s32.totalorder %s3247_s30, %s4392_s5 }
 0x144   : > { %p3249_p9 = scmp.ne.s32.totalorder %s3247_s30, %s3248_s26  ;;  %p3254_p13 = scmp.lt.s32.totalorder %s3252_s21, %s3248_s26 }
 0x145   : > { %2068 = vrot.lane.b32.xlu2 %v2059_v8, %s3337_s17 }
 0x146   : > { %p3250_p10 = pnand %p3249_p9, %p3420_p3  ;;  %p3255_p0 = por %p3254_p13, %p3253_p12 }
 0x147   : > { %v1939_v36 = vpop.permute.xlu0 %1938 }
 0x148   : > { %v2160_v37 = vsel %vm2158_vm4, %v2143_v44, %v1939_v36  ;;  %v3042_v36 = vld [vmem:[#allocation2 + $0xc] sm:$0xff]  ;;  %p3251_p11 = pneg %p3250_p10 }
 0x149   : > { %v2177_v18 = vsel %vm2175_vm5, %v2160_v37, %v1987_v56 }
 0x14a   : > { %v2027_v2 = vpop.permute.xlu1 %2026  ;;  %p3256_p1 = pnand %p3255_p0, %p3251_p11 }
 0x14b   : > { %v1781_v20 = vpop.permute.xlu2 %1780  ;;  %v2194_v24 = vsel %vm2192_vm6, %v2177_v18, %v2027_v2 }
 0x14c   : > { %v2100_v32 = vsel %vm2082_vm15, %v3046_v21, %v1781_v20 }
 0x14f   : > { %v1991_v23 = vpop.permute.xlu0 %1990 }
 0x150   : > { %v2181_v62 = vsel %vm2175_vm5, %v2164_v50, %v1991_v23 }
 0x151   : > { %v2198_v48 = vsel %vm2192_vm6, %v2181_v62, %v2031_v35 }
 0x152   : > { %v2071_v38 = vpop.permute.xlu1 %2070 }
 0x153   : > { %v1825_v28 = vpop.permute.xlu2 %1824  ;;  %v2215_v57 = vsel %vm2209_vm7, %v2198_v48, %v2071_v38 }
 0x154   : > { %3010 = vmatmul.msk.bf16.vlgmr.msra.gmra.mxu1 %vm2266_vm8, %v2215_v57 }
 0x157   : > { %v2067_v7 = vpop.permute.xlu0 %2066 }
 0x158   : > { %v2211_v16 = vsel %vm2209_vm7, %v2194_v24, %v2067_v7 }
 0x159   : > { %3008 = vmatmul.msk.bf16.vlgmr.msra.gmra.mxu0 %vm2266_vm8, %v2211_v16 }
 0x15a   : > { %v1821_v60 = vpop.permute.xlu1 %1820 }
 0x15b   : > { %v1909_v10 = vpop.permute.xlu2 %1908  ;;  %v2119_v41 = vsel %vm2107_vm0, %v2100_v32, %v1821_v60 }
 0x15f   : > { %v1785_v42 = vpop.permute.xlu0 %1784 }
 0x160   : > { %v2106_v56 = vsel %vm2082_vm15, %v3048_v52, %v1785_v42  ;;  %v4221_v42 = vld [vmem:[%s4391_s4] ss:$0 sm:$0xff] }
 0x161   : > { %v2123_v0 = vsel %vm2107_vm0, %v2106_v56, %v1825_v28 }
 0x162   : > { %v1873_v30 = vpop.permute.xlu1 %1872 }
 0x163   : > { %v1953_v33 = vpop.permute.xlu2 %1952  ;;  %v2140_v5 = vsel %vm2124_vm2, %v2123_v0, %v1873_v30 }
 0x167   : > { %v1869_v31 = vpop.permute.xlu0 %1868 }
 0x168   : > { %v2136_v54 = vsel %vm2124_vm2, %v2119_v41, %v1869_v31 }
 0x169   : > { %v2153_v43 = vsel %vm2141_vm3, %v2136_v54, %v1909_v10 }
 0x16a   : > { %v1949_v26 = vpop.permute.xlu1 %1948 }
 0x16b   : > { %v1773_v49 = vpop.permute.xlu2 %1772  ;;  %v2170_v45 = vsel %vm2158_vm4, %v2153_v43, %v1949_v26 }
 0x16c   : > { %v2088_v2 = vsel %vm2082_vm15, %v3042_v36, %v1773_v49 }
 0x16f   : > { %v1913_v25 = vpop.permute.xlu0 %1912 }
 0x170   : > { %v2157_v59 = vsel %vm2141_vm3, %v2140_v5, %v1913_v25 }
 0x171   : > { %v2174_v13 = vsel %vm2158_vm4, %v2157_v59, %v1953_v33 }
 0x172   : > { %v2001_v34 = vpop.permute.xlu1 %2000 }
 0x173   : > { %v2041_v39 = vpop.permute.xlu2 %2040  ;;  %v2191_v17 = vsel %vm2175_vm5, %v2174_v13, %v2001_v34 }
 0x174   : > { %v2208_v4 = vsel %vm2192_vm6, %v2191_v17, %v2041_v39 }
 0x177   : > { %v1997_v51 = vpop.permute.xlu0 %1996 }
 0x178   : > { %v2187_v46 = vsel %vm2175_vm5, %v2170_v45, %v1997_v51 }
 0x17a   : > { %v2037_v27 = vpop.permute.xlu1 %2036 }
 0x17b   : > { %v2204_v47 = vsel %vm2192_vm6, %v2187_v46, %v2037_v27  ;;  %v2077_v29 = vpop.permute.xlu2 %2076 }
 0x17c   : > { %v2221_v11 = vsel %vm2209_vm7, %v2204_v47, %v2077_v29 }
 0x17d   : > { %3013 = vmatmul.msk.bf16.gmra.mxu2 %vm2266_vm8, %v2221_v11 }
 0x17f   : > { %v1777_v53 = vpop.permute.xlu0 %1776 }
 0x180   : > { %v2094_v50 = vsel %vm2082_vm15, %v3044_v19, %v1777_v53 }
 0x182   : > { %v1817_v3 = vpop.permute.xlu1 %1816 }
 0x183   : > { %v1865_v58 = vpop.permute.xlu2 %1864  ;;  %v2115_v23 = vsel %vm2107_vm0, %v2094_v50, %v1817_v3 }
 0x184   : > { %v2132_v37 = vsel %vm2124_vm2, %v2115_v23, %v1865_v58 }
 0x187   : > { %v1813_v15 = vpop.permute.xlu0 %1812 }
 0x188   : > { %v2111_v20 = vsel %vm2107_vm0, %v2088_v2, %v1813_v15 }
 0x18a   : > { %v1861_v6 = vpop.permute.xlu1 %1860 }
 0x18b   : > { %v2128_v22 = vsel %vm2124_vm2, %v2111_v20, %v1861_v6 }
 0x18f   : > { %v2081_v1 = vpop.permute.xlu0 %2080  ;;  %v1941_v35 = vpop.permute.xlu2 %1940 }
 0x190   : > { %v2225_v63 = vsel %vm2209_vm7, %v2208_v4, %v2081_v1 }
 0x191   : > { %3015 = vmatmul.msk.bf16.gmra.mxu3 %vm2266_vm8, %v2225_v63 }
 0x192   : > { %v1905_v40 = vpop.permute.xlu1 %1904 }
 0x193   : > { %v2149_v57 = vsel %vm2141_vm3, %v2132_v37, %v1905_v40 }
 0x197   : > { %v1901_v8 = vpop.permute.xlu0 %1900  ;;  %v1993_v9 = vpop.permute.xlu2 %1992 }
 0x198   : > { %v2145_v55 = vsel %vm2141_vm3, %v2128_v22, %v1901_v8 }
 0x199   : > { %v2162_v62 = vsel %vm2158_vm4, %v2145_v55, %v1941_v35 }
 0x19a   : > { %v1989_v61 = vpop.permute.xlu1 %1988 }
 0x19b   : > { %v2179_v44 = vsel %vm2175_vm5, %v2162_v62, %v1989_v61 }
 0x19f   : > { %v1945_v14 = vpop.permute.xlu0 %1944  ;;  %v2069_v12 = vpop.permute.xlu2 %2068 }
 0x1a0   : > { %v2166_v18 = vsel %vm2158_vm4, %v2149_v57, %v1945_v14 }
 0x1a1   : > { %v2183_v7 = vsel %vm2175_vm5, %v2166_v18, %v1993_v9 }
 0x1a2   : > { %v2033_v24 = vpop.permute.xlu1 %2032 }
 0x1a3   : > { %v2200_v16 = vsel %vm2192_vm6, %v2183_v7, %v2033_v24 }
 0x1a7   : > { %v2029_v38 = vpop.permute.xlu0 %2028 }
 0x1a8   : > { %v2196_v48 = vsel %vm2192_vm6, %v2179_v44, %v2029_v38 }
 0x1a9   : > { %v2213_v28 = vsel %vm2209_vm7, %v2196_v48, %v2069_v12 }
 0x1aa   : > { %3009 = vmatmul.msk.bf16.gmra.mxu0 %vm2266_vm8, %v2213_v28 }
 0x1af   : > { %v2073_v60 = vpop.permute.xlu0 %2072 }
 0x1b0   : > { %v2217_v10 = vsel %vm2209_vm7, %v2200_v16, %v2073_v60 }
 0x1b1   : > { %3011 = vmatmul.msk.bf16.gmra.mxu1 %vm2266_vm8, %v2217_v10 }
 0x1b6   : > { %v2326_v30 = vpop.f32.mrf.mxu3 }
 0x1b7   : > { %v2327_v33 = vadd.f32 %v4221_v42, %v2326_v30 }
 0x1b9   : > { %v3028_v31 = vmul.f32 -1.442695, %v2327_v33 }
 0x1bb   : > { %3168 = vpow2.f32 %v3028_v31 }
 0x1bc   : > { %v2316_v26 = vpop.f32.mrf.mxu2 }
 0x1bd   : > { %v4226_v49 = vadd.f32 %v4221_v42, %v2316_v26 }
 0x1be   : > { %v2328_v25 = vpop.f32.mrf.mxu3 }
 0x1bf   : > { %v3024_v21 = vmul.f32 -1.442695, %v4226_v49  ;;  %v4230_v32 = vadd.f32 %v4221_v42, %v2328_v25 }
 0x1c1   : > { %3170 = vpow2.f32 %v3024_v21  ;;  %v3169_v34 = vpop.eup %3168  ;;  %v3029_v39 = vmul.f32 -1.442695, %v4230_v32 }
 0x1c2   : > { %v2396_v41 = vadd.f32 1.0, %v3169_v34 }
 0x1c3   : > { %3172 = vpow2.f32 %v3029_v39 }
 0x1c4   : > { %v2318_v54 = vpop.f32.mrf.mxu2  ;;  %3174 = vrcp.f32 %v2396_v41  ;;  %v2589_v53 = vand.u32 2147483647, %v2396_v41  ;;  %v2591_v56 = vand.u32 2147483648, %v2396_v41  ;;  %vm2585_vm10 = vweird.f32 %v2396_v41 }
 0x1c5   : > { %v4234_v51 = vadd.f32 %v4221_v42, %v2318_v54 }
 0x1c6   : > { %vm2590_vm12 = vcmp.eq.f32.partialorder %v2589_v53, 8.507059e+37  ;;  %v2592_v63 = vor.u32 1.1754944e-38, %v2591_v56 }
 0x1c7   : > { %v3171_v43 = vpop.eup %3170  ;;  %v3025_v46 = vmul.f32 -1.442695, %v4234_v51 }
 0x1c8   : > { %v2392_v45 = vadd.f32 1.0, %v3171_v43 }
 0x1c9   : > { %v3173_v27 = vpop.eup %3172 }
 0x1ca   : > { %3176 = vrcp.f32 %v2392_v45  ;;  %v3175_v47 = vpop.eup %3174  ;;  %v4237_v29 = vadd.f32 1.0, %v3173_v27  ;;  %v2531_v17 = vand.u32 2147483648, %v2392_v45  ;;  %vm2525_vm14 = vweird.f32 %v2392_v45 }
 0x1cb   : > { %3178 = vpow2.f32 %v3025_v46  ;;  %v2581_v11 = vmul.f32 %v3175_v47, %v2396_v41  ;;  %vm2586_vm9 = vweird.f32 %v3175_v47  ;;  %v2529_v9 = vand.u32 2147483647, %v2392_v45 }
 0x1cc   : > { %3180 = vrcp.f32 %v4237_v29  ;;  %vm2587_vm11 = vmor %vm2585_vm10, %vm2586_vm9  ;;  %v2532_v2 = vor.u32 1.1754944e-38, %v2531_v17  ;;  %v2604_v55 = vand.u32 2147483647, %v4237_v29  ;;  %v2606_v50 = vand.u32 2147483648, %v4237_v29 }
 0x1cd   : > { %v2582_v52 = vsub.f32 1.0, %v2581_v11  ;;  %vm2530_vm2 = vcmp.eq.f32.partialorder %v2529_v9, 8.507059e+37  ;;  %vm2600_vm3 = vweird.f32 %v4237_v29 }
 0x1ce   : > { %v2607_v7 = vor.u32 1.1754944e-38, %v2606_v50  ;;  %vm2605_vm5 = vcmp.eq.f32.partialorder %v2604_v55, 8.507059e+37 }
 0x1cf   : > { %v2583_v5 = vmul.f32 %v3175_v47, %v2582_v52 }
 0x1d0   : > { %v3177_v0 = vpop.eup %3176 }
 0x1d1   : > { %v3179_v15 = vpop.eup %3178  ;;  %v2521_v59 = vmul.f32 %v3177_v0, %v2392_v45  ;;  %v2306_v3 = vpop.f32.mrf.mxu1  ;;  %v2584_v13 = vadd.f32 %v3175_v47, %v2583_v5  ;;  %vm2526_vm15 = vweird.f32 %v3177_v0 }
 0x1d2   : > { %v4240_v58 = vadd.f32 1.0, %v3179_v15  ;;  %v4243_v4 = vadd.f32 %v4221_v42, %v2306_v3  ;;  %v3181_v1 = vpop.eup %3180  ;;  %vm2527_vm0 = vmor %vm2525_vm14, %vm2526_vm15 }
 0x1d3   : > { %v2522_v6 = vsub.f32 1.0, %v2521_v59  ;;  %v2588_v35 = vsel %vm2587_vm11, %v3175_v47, %v2584_v13  ;;  %v2596_v8 = vmul.f32 %v3181_v1, %v4237_v29  ;;  %vm2601_vm1 = vweird.f32 %v3181_v1 }
 0x1d4   : > { %3182 = vrcp.f32 %v4240_v58  ;;  %v2593_v40 = vsel %vm2590_vm12, %v2592_v63, %v2588_v35  ;;  %v3020_v20 = vmul.f32 -1.442695, %v4243_v4  ;;  %vm2602_vm4 = vmor %vm2600_vm3, %vm2601_vm1  ;;  %v2544_v25 = vand.u32 2147483647, %v4240_v58 }
 0x1d5   : > { %v2523_v36 = vmul.f32 %v3177_v0, %v2522_v6  ;;  %v2652_v14 = vmul.f32 %v2593_v40, %v2327_v33  ;;  %v2597_v19 = vsub.f32 1.0, %v2596_v8  ;;  %vm2540_vm7 = vweird.f32 %v4240_v58 }
 0x1d6   : > { %v2296_v22 = vpop.f32.mrf.mxu0  ;;  %3184 = vpow2.f32 %v3020_v20  ;;  %vm2545_vm9 = vcmp.eq.f32.partialorder %v2544_v25, 8.507059e+37 }
 0x1d7   : > { %v2524_v61 = vadd.f32 %v3177_v0, %v2523_v36  ;;  %v4251_v23 = vadd.f32 %v4221_v42, %v2296_v22  ;;  %v2668_v62 = vpack.c.bf16 %v2652_v14, %v2652_v14  ;;  %v2598_v12 = vmul.f32 %v3181_v1, %v2597_v19 }
 0x1d9   : > { %v2528_v44 = vsel %vm2527_vm0, %v3177_v0, %v2524_v61  ;;  %v3016_v38 = vmul.f32 -1.442695, %v4251_v23  ;;  %v2308_v48 = vpop.f32.mrf.mxu1  ;;  %2685 = vst.msk [vmem:[%s3619_s15 + $0x30] sm:$0xf] %vm2672_vm13, %v2668_v62  ;;  %v2599_v57 = vadd.f32 %v3181_v1, %v2598_v12 }
 0x1da   : > { %v3183_v37 = vpop.eup %3182  ;;  %v2533_v28 = vsel %vm2530_vm2, %v2532_v2, %v2528_v44  ;;  %v4259_v18 = vadd.f32 %v4221_v42, %v2308_v48 }
 0x1db   : > { %v2648_v24 = vmul.f32 %v2533_v28, %v4226_v49  ;;  %v2536_v16 = vmul.f32 %v3183_v37, %v4240_v58  ;;  %3186 = vpow2.f32 %v3016_v38  ;;  %v2603_v60 = vsel %vm2602_vm4, %v3181_v1, %v2599_v57 }
 0x1dc   : > { %v3021_v10 = vmul.f32 -1.442695, %v4259_v18  ;;  %v2608_v33 = vsel %vm2605_vm5, %v2607_v7, %v2603_v60  ;;  %v3185_v26 = vpop.eup %3184  ;;  %v2546_v49 = vand.u32 2147483648, %v4240_v58  ;;  %vm2541_vm6 = vweird.f32 %v3183_v37 }
 0x1dd   : > { %v2664_v30 = vpack.c.bf16 %v2648_v24, %v2648_v24  ;;  %v2537_v31 = vsub.f32 1.0, %v2536_v16  ;;  %v2653_v21 = vmul.f32 %v2608_v33, %v4230_v32  ;;  %v2388_v41 = vadd.f32 1.0, %v3185_v26  ;;  %vm2542_vm8 = vmor %vm2540_vm7, %vm2541_vm6 }
 0x1de   : > { %3188 = vpow2.f32 %v3021_v10  ;;  %v2298_v34 = vpop.f32.mrf.mxu0  ;;  %v2547_v32 = vor.u32 1.1754944e-38, %v2546_v49 }
 0x1df   : > { %2681 = vst.msk [vmem:[%s3619_s15 + $0x20] sm:$0xf] %vm2672_vm13, %v2664_v30  ;;  %v2538_v39 = vmul.f32 %v3183_v37, %v2537_v31  ;;  %v4270_v54 = vadd.f32 %v4221_v42, %v2298_v34  ;;  %v2669_v43 = vpack.c.bf16 %v2653_v21, %v2653_v21  ;;  %3190 = vrcp.f32 %v2388_v41 }
 0x1e0   : > { %v2471_v13 = vand.u32 2147483648, %v2388_v41  ;;  %v2469_v63 = vand.u32 2147483647, %v2388_v41  ;;  %vm2465_vm11 = vweird.f32 %v2388_v41 }
 0x1e1   : > { %v3187_v45 = vpop.eup %3186  ;;  %v2539_v46 = vadd.f32 %v3183_v37, %v2538_v39  ;;  %2686 = vst.msk [vmem:[%s3619_s15 + $0x34] sm:$0xf] %vm2672_vm13, %v2669_v43  ;;  %v3017_v47 = vmul.f32 -1.442695, %v4270_v54 }
 0x1e2   : > { %v2384_v27 = vadd.f32 1.0, %v3187_v45  ;;  %v2472_v36 = vor.u32 1.1754944e-38, %v2471_v13  ;;  %vm2470_vm15 = vcmp.eq.f32.partialorder %v2469_v63, 8.507059e+37 }
 0x1e3   : > { %v2543_v29 = vsel %vm2542_vm8, %v3183_v37, %v2539_v46 }
 0x1e4   : > { %v3189_v11 = vpop.eup %3188  ;;  %v2548_v52 = vsel %vm2545_vm9, %v2547_v32, %v2543_v29  ;;  %3192 = vrcp.f32 %v2384_v27  ;;  %v2411_v8 = vand.u32 2147483648, %v2384_v27  ;;  %v2409_v2 = vand.u32 2147483647, %v2384_v27 }
 0x1e5   : > { %v2649_v53 = vmul.f32 %v2548_v52, %v4234_v51  ;;  %v2389_v56 = vadd.f32 1.0, %v3189_v11  ;;  %3194 = vpow2.f32 %v3017_v47  ;;  %v3191_v0 = vpop.eup %3190  ;;  %vm2405_vm0 = vweird.f32 %v2384_v27 }
 0x1e6   : > { %v2461_v15 = vmul.f32 %v3191_v0, %v2388_v41  ;;  %vm2466_vm10 = vweird.f32 %v3191_v0  ;;  %v2412_v55 = vor.u32 1.1754944e-38, %v2411_v8  ;;  %vm2410_vm3 = vcmp.eq.f32.partialorder %v2409_v2, 8.507059e+37 }
 0x1e7   : > { %v2665_v5 = vpack.c.bf16 %v2649_v53, %v2649_v53  ;;  %3196 = vrcp.f32 %v2389_v56  ;;  %vm2467_vm12 = vmor %vm2465_vm11, %vm2466_vm10  ;;  %v2486_v50 = vand.u32 2147483648, %v2389_v56  ;;  %v2484_v44 = vand.u32 2147483647, %v2389_v56 }
 0x1e8   : > { %v2462_v3 = vsub.f32 1.0, %v2461_v15  ;;  %vm2480_vm4 = vweird.f32 %v2389_v56 }
 0x1e9   : > { %2682 = vst.msk [vmem:[%s3619_s15 + $0x24] sm:$0xf] %vm2672_vm13, %v2665_v5  ;;  %v2487_v7 = vor.u32 1.1754944e-38, %v2486_v50  ;;  %vm2485_vm6 = vcmp.eq.f32.partialorder %v2484_v44, 8.507059e+37 }
 0x1ea   : > { %v3193_v59 = vpop.eup %3192  ;;  %v2463_v1 = vmul.f32 %v3191_v0, %v2462_v3 }
 0x1eb   : > { %v2401_v17 = vmul.f32 %v3193_v59, %v2384_v27  ;;  %v3195_v58 = vpop.eup %3194  ;;  %vm2406_vm14 = vweird.f32 %v3193_v59 }
 0x1ec   : > { %v2385_v51 = vadd.f32 1.0, %v3195_v58  ;;  %v2464_v40 = vadd.f32 %v3191_v0, %v2463_v1  ;;  %vm2407_vm1 = vmor %vm2405_vm0, %vm2406_vm14 }
 0x1ed   : > { %v3197_v6 = vpop.eup %3196  ;;  %v2402_v35 = vsub.f32 1.0, %v2401_v17 }
 0x1ee   : > { %v2476_v9 = vmul.f32 %v3197_v6, %v2389_v56  ;;  %3198 = vrcp.f32 %v2385_v51  ;;  %v2468_v19 = vsel %vm2467_vm12, %v3191_v0, %v2464_v40  ;;  %vm2481_vm2 = vweird.f32 %v3197_v6 }
 0x1ef   : > { %v2403_v14 = vmul.f32 %v3193_v59, %v2402_v35  ;;  %v2473_v22 = vsel %vm2470_vm15, %v2472_v36, %v2468_v19  ;;  %vm2482_vm5 = vmor %vm2480_vm4, %vm2481_vm2  ;;  %v2426_v31 = vand.u32 2147483648, %v2385_v51  ;;  %vm2420_vm8 = vweird.f32 %v2385_v51 }
 0x1f0   : > { %v2477_v20 = vsub.f32 1.0, %v2476_v9  ;;  %v2644_v62 = vmul.f32 %v2473_v22, %v4243_v4 }
 0x1f1   : > { %v2404_v61 = vadd.f32 %v3193_v59, %v2403_v14  ;;  %v2427_v49 = vor.u32 1.1754944e-38, %v2426_v31 }
 0x1f2   : > { %v2478_v12 = vmul.f32 %v3197_v6, %v2477_v20  ;;  %v2660_v48 = vpack.c.bf16 %v2644_v62, %v2644_v62 }
 0x1f3   : > { %v2408_v38 = vsel %vm2407_vm1, %v3193_v59, %v2404_v61 }
 0x1f4   : > { %v2413_v37 = vsel %vm2410_vm3, %v2412_v55, %v2408_v38  ;;  %v2479_v28 = vadd.f32 %v3197_v6, %v2478_v12  ;;  %v3199_v57 = vpop.eup %3198  ;;  %2677 = vst.msk [vmem:[%s3619_s15 + $0x10] sm:$0xf] %vm2672_vm13, %v2660_v48 }
 0x1f5   : > { %v2640_v24 = vmul.f32 %v2413_v37, %v4251_v23  ;;  %v2416_v16 = vmul.f32 %v3199_v57, %v2385_v51  ;;  %vm2421_vm7 = vweird.f32 %v3199_v57  ;;  %v2424_v23 = vand.u32 2147483647, %v2385_v51 }
 0x1f6   : > { %v2483_v4 = vsel %vm2482_vm5, %v3197_v6, %v2479_v28  ;;  %vm2422_vm9 = vmor %vm2420_vm8, %vm2421_vm7 }
 0x1f7   : > { %v2656_v60 = vpack.c.bf16 %v2640_v24, %v2640_v24  ;;  %v2488_v10 = vsel %vm2485_vm6, %v2487_v7, %v2483_v4  ;;  %v2417_v33 = vsub.f32 1.0, %v2416_v16  ;;  %vm2425_vm10 = vcmp.eq.f32.partialorder %v2424_v23, 8.507059e+37 }
 0x1f8   : > { %v2645_v30 = vmul.f32 %v2488_v10, %v4259_v18 }
 0x1f9   : > { %2673 = vst.msk [vmem:[%s3619_s15] sm:$0xf] %vm2672_vm13, %v2656_v60  ;;  %v2418_v21 = vmul.f32 %v3199_v57, %v2417_v33 }
 0x1fa   : > { %v2661_v26 = vpack.c.bf16 %v2645_v30, %v2645_v30 }
 0x1fb   : > { %v2419_v25 = vadd.f32 %v3199_v57, %v2418_v21 }
 0x1fc   : > { %2678 = vst.msk [vmem:[%s3619_s15 + $0x14] sm:$0xf] %vm2672_vm13, %v2661_v26 }
 0x1fd   : > { %v2423_v34 = vsel %vm2422_vm9, %v3199_v57, %v2419_v25 }
 0x1fe   : > { %v2428_v39 = vsel %vm2425_vm10, %v2427_v49, %v2423_v34 }
 0x1ff   : > { %v2641_v18 = vmul.f32 %v2428_v39, %v4270_v54 }
 0x200   : > { %v2321_v41 = vpop.f32.mrf.mxu2 }
 0x201   : > { %v2322_v43 = vadd.f32 %v4221_v42, %v2321_v41  ;;  %v2657_v45 = vpack.c.bf16 %v2641_v18, %v2641_v18 }
 0x203   : > { %v3026_v46 = vmul.f32 -1.442695, %v2322_v43  ;;  %2674 = vst.msk [vmem:[%s3619_s15 + $0x4] sm:$0xf] %vm2672_vm13, %v2657_v45 }
 0x205   : > { %3200 = vpow2.f32 %v3026_v46 }
 0x208   : > { %v2323_v32 = vpop.f32.mrf.mxu2 }
 0x209   : > { %v2324_v27 = vadd.f32 %v4221_v42, %v2323_v32 }
 0x20b   : > { %v3201_v47 = vpop.eup %3200  ;;  %v3027_v29 = vmul.f32 -1.442695, %v2324_v27 }
 0x20c   : > { %v2394_v11 = vadd.f32 1.0, %v3201_v47 }
 0x20d   : > { %3202 = vpow2.f32 %v3027_v29 }
 0x20e   : > { %3204 = vrcp.f32 %v2394_v11  ;;  %v2561_v3 = vand.u32 2147483648, %v2394_v11  ;;  %v2559_v17 = vand.u32 2147483647, %v2394_v11  ;;  %vm2555_vm12 = vweird.f32 %v2394_v11 }
 0x210   : > { %v2562_v63 = vor.u32 1.1754944e-38, %v2561_v3  ;;  %vm2560_vm15 = vcmp.eq.f32.partialorder %v2559_v17, 8.507059e+37 }
 0x213   : > { %v3203_v52 = vpop.eup %3202 }
 0x214   : > { %v3205_v53 = vpop.eup %3204  ;;  %v2395_v56 = vadd.f32 1.0, %v3203_v52  ;;  %v2331_v54 = vpop.f32.mrf.mxu3 }
 0x215   : > { %v2551_v0 = vmul.f32 %v3205_v53, %v2394_v11  ;;  %v4294_v5 = vadd.f32 %v4221_v42, %v2331_v54  ;;  %vm2556_vm11 = vweird.f32 %v3205_v53 }
 0x216   : > { %3206 = vrcp.f32 %v2395_v56  ;;  %vm2557_vm14 = vmor %vm2555_vm12, %vm2556_vm11  ;;  %v2574_v19 = vand.u32 2147483647, %v2395_v56  ;;  %v2576_v20 = vand.u32 2147483648, %v2395_v56  ;;  %vm2570_vm1 = vweird.f32 %v2395_v56 }
 0x217   : > { %v2552_v15 = vsub.f32 1.0, %v2551_v0  ;;  %v3030_v59 = vmul.f32 -1.442695, %v4294_v5 }
 0x218   : > { %v2577_v62 = vor.u32 1.1754944e-38, %v2576_v20  ;;  %vm2575_vm3 = vcmp.eq.f32.partialorder %v2574_v19, 8.507059e+37 }
 0x219   : > { %v2553_v13 = vmul.f32 %v3205_v53, %v2552_v15  ;;  %3208 = vpow2.f32 %v3030_v59 }
 0x21b   : > { %v2554_v58 = vadd.f32 %v3205_v53, %v2553_v13 }
 0x21c   : > { %v3207_v1 = vpop.eup %3206  ;;  %v2333_v6 = vpop.f32.mrf.mxu3 }
 0x21d   : > { %v2558_v35 = vsel %vm2557_vm14, %v3205_v53, %v2554_v58  ;;  %v2566_v8 = vmul.f32 %v3207_v1, %v2395_v56  ;;  %v4298_v51 = vadd.f32 %v4221_v42, %v2333_v6  ;;  %vm2571_vm0 = vweird.f32 %v3207_v1 }
 0x21e   : > { %v2563_v40 = vsel %vm2560_vm15, %v2562_v63, %v2558_v35  ;;  %vm2572_vm2 = vmor %vm2570_vm1, %vm2571_vm0 }
 0x21f   : > { %v3209_v36 = vpop.eup %3208  ;;  %v2650_v9 = vmul.f32 %v2563_v40, %v2322_v43  ;;  %v2567_v14 = vsub.f32 1.0, %v2566_v8  ;;  %v3031_v2 = vmul.f32 -1.442695, %v4298_v51 }
 0x220   : > { %v2398_v22 = vadd.f32 1.0, %v3209_v36 }
 0x221   : > { %v2666_v61 = vpack.c.bf16 %v2650_v9, %v2650_v9  ;;  %v2568_v55 = vmul.f32 %v3207_v1, %v2567_v14  ;;  %3210 = vpow2.f32 %v3031_v2 }
 0x222   : > { %3212 = vrcp.f32 %v2398_v22  ;;  %v2621_v16 = vand.u32 2147483648, %v2398_v22  ;;  %v2619_v30 = vand.u32 2147483647, %v2398_v22  ;;  %vm2615_vm5 = vweird.f32 %v2398_v22 }
 0x223   : > { %2683 = vst.msk [vmem:[%s3619_s15 + $0x28] sm:$0xf] %vm2672_vm13, %v2666_v61  ;;  %v2569_v50 = vadd.f32 %v3207_v1, %v2568_v55 }
 0x224   : > { %v2622_v21 = vor.u32 1.1754944e-38, %v2621_v16  ;;  %vm2620_vm7 = vcmp.eq.f32.partialorder %v2619_v30, 8.507059e+37 }
 0x225   : > { %v2573_v12 = vsel %vm2572_vm2, %v3207_v1, %v2569_v50 }
 0x226   : > { %v2578_v44 = vsel %vm2575_vm3, %v2577_v62, %v2573_v12 }
 0x227   : > { %v3211_v38 = vpop.eup %3210  ;;  %v2651_v48 = vmul.f32 %v2578_v44, %v2324_v27  ;;  %v2301_v4 = vpop.f32.mrf.mxu0 }
 0x228   : > { %v3213_v37 = vpop.eup %3212  ;;  %v2399_v28 = vadd.f32 1.0, %v3211_v38  ;;  %v4306_v60 = vadd.f32 %v4221_v42, %v2301_v4 }
 0x229   : > { %v2667_v57 = vpack.c.bf16 %v2651_v48, %v2651_v48  ;;  %v2611_v24 = vmul.f32 %v3213_v37, %v2398_v22  ;;  %vm2616_vm4 = vweird.f32 %v3213_v37 }
 0x22a   : > { %3214 = vrcp.f32 %v2399_v28  ;;  %v3018_v33 = vmul.f32 -1.442695, %v4306_v60  ;;  %vm2617_vm6 = vmor %vm2615_vm5, %vm2616_vm4  ;;  %v2634_v45 = vand.u32 2147483647, %v2399_v28  ;;  %v2636_v46 = vand.u32 2147483648, %v2399_v28 }
 0x22b   : > { %2684 = vst.msk [vmem:[%s3619_s15 + $0x2c] sm:$0xf] %vm2672_vm13, %v2667_v57  ;;  %v2612_v7 = vsub.f32 1.0, %v2611_v24  ;;  %vm2630_vm9 = vweird.f32 %v2399_v28 }
 0x22c   : > { %3216 = vpow2.f32 %v3018_v33  ;;  %v2637_v54 = vor.u32 1.1754944e-38, %v2636_v46  ;;  %vm2635_vm11 = vcmp.eq.f32.partialorder %v2634_v45, 8.507059e+37 }
 0x22d   : > { %v2613_v10 = vmul.f32 %v3213_v37, %v2612_v7 }
 0x22e   : > { %v2311_v34 = vpop.f32.mrf.mxu1 }
 0x22f   : > { %v2614_v31 = vadd.f32 %v3213_v37, %v2613_v10  ;;  %v4311_v41 = vadd.f32 %v4221_v42, %v2311_v34  ;;  %v2303_v43 = vpop.f32.mrf.mxu0 }
 0x230   : > { %v3215_v26 = vpop.eup %3214  ;;  %v4314_v32 = vadd.f32 %v4221_v42, %v2303_v43 }
 0x231   : > { %v2618_v23 = vsel %vm2617_vm6, %v3213_v37, %v2614_v31  ;;  %v2626_v25 = vmul.f32 %v3215_v26, %v2399_v28  ;;  %vm2631_vm8 = vweird.f32 %v3215_v26  ;;  %v3022_v29 = vmul.f32 -1.442695, %v4311_v41 }
 0x232   : > { %v2623_v49 = vsel %vm2620_vm7, %v2622_v21, %v2618_v23  ;;  %v3217_v11 = vpop.eup %3216  ;;  %v3019_v52 = vmul.f32 -1.442695, %v4314_v32  ;;  %vm2632_vm10 = vmor %vm2630_vm9, %vm2631_vm8 }
 0x233   : > { %v2654_v39 = vmul.f32 %v2623_v49, %v4294_v5  ;;  %v2627_v18 = vsub.f32 1.0, %v2626_v25  ;;  %v2386_v56 = vadd.f32 1.0, %v3217_v11  ;;  %3218 = vpow2.f32 %v3022_v29 }
 0x234   : > { %3220 = vpow2.f32 %v3019_v52 }
 0x235   : > { %v2670_v27 = vpack.c.bf16 %v2654_v39, %v2654_v39  ;;  %v2628_v47 = vmul.f32 %v3215_v26, %v2627_v18  ;;  %3222 = vrcp.f32 %v2386_v56  ;;  %v2441_v36 = vand.u32 2147483648, %v2386_v56 }
 0x236   : > { %v2313_v15 = vpop.f32.mrf.mxu1  ;;  %vm2435_vm14 = vweird.f32 %v2386_v56 }
 0x237   : > { %2687 = vst.msk [vmem:[%s3619_s15 + $0x38] sm:$0xf] %vm2672_vm13, %v2670_v27  ;;  %v2629_v53 = vadd.f32 %v3215_v26, %v2628_v47  ;;  %v4322_v3 = vadd.f32 %v4221_v42, %v2313_v15  ;;  %v2439_v42 = vand.u32 2147483647, %v2386_v56  ;;  %v2442_v22 = vor.u32 1.1754944e-38, %v2441_v36 }
 0x239   : > { %v2633_v0 = vsel %vm2632_vm10, %v3215_v26, %v2629_v53  ;;  %v3219_v13 = vpop.eup %3218  ;;  %v3023_v58 = vmul.f32 -1.442695, %v4322_v3  ;;  %vm2440_vm0 = vcmp.eq.f32.partialorder %v2439_v42, 8.507059e+37 }
 0x23a   : > { %v2638_v5 = vsel %vm2635_vm11, %v2637_v54, %v2633_v0  ;;  %v3221_v1 = vpop.eup %3220  ;;  %v2390_v63 = vadd.f32 1.0, %v3219_v13 }
 0x23b   : > { %v2655_v59 = vmul.f32 %v2638_v5, %v4298_v51  ;;  %v3223_v6 = vpop.eup %3222  ;;  %v2387_v35 = vadd.f32 1.0, %v3221_v1  ;;  %3224 = vpow2.f32 %v3023_v58 }
 0x23c   : > { %v2431_v8 = vmul.f32 %v3223_v6, %v2386_v56  ;;  %3226 = vrcp.f32 %v2390_v63  ;;  %vm2436_vm12 = vweird.f32 %v3223_v6  ;;  %v2501_v38 = vand.u32 2147483648, %v2390_v63 }
 0x23d   : > { %v2671_v17 = vpack.c.bf16 %v2655_v59, %v2655_v59  ;;  %3228 = vrcp.f32 %v2387_v35  ;;  %vm2437_vm15 = vmor %vm2435_vm14, %vm2436_vm12  ;;  %v2499_v28 = vand.u32 2147483647, %v2390_v63  ;;  %v2456_v57 = vand.u32 2147483648, %v2387_v35 }
 0x23e   : > { %v2432_v40 = vsub.f32 1.0, %v2431_v8  ;;  %v2454_v4 = vand.u32 2147483647, %v2387_v35  ;;  %vm2495_vm3 = vweird.f32 %v2390_v63  ;;  %vm2450_vm5 = vweird.f32 %v2387_v35 }
 0x23f   : > { %2688 = vst.msk [vmem:[%s3619_s15 + $0x3c] sm:$0xf] %vm2672_vm13, %v2671_v17  ;;  %vm2500_vm6 = vcmp.eq.f32.partialorder %v2499_v28, 8.507059e+37  ;;  %v2457_v31 = vor.u32 1.1754944e-38, %v2456_v57 }
 0x240   : > { %v2433_v51 = vmul.f32 %v3223_v6, %v2432_v40  ;;  %vm2455_vm8 = vcmp.eq.f32.partialorder %v2454_v4, 8.507059e+37 }
 0x241   : > { %v3225_v9 = vpop.eup %3224 }
 0x242   : > { %v3227_v14 = vpop.eup %3226  ;;  %v2434_v2 = vadd.f32 %v3223_v6, %v2433_v51  ;;  %v2391_v19 = vadd.f32 1.0, %v3225_v9 }
 0x243   : > { %v3229_v20 = vpop.eup %3228  ;;  %v2491_v61 = vmul.f32 %v3227_v14, %v2390_v63  ;;  %vm2496_vm1 = vweird.f32 %v3227_v14 }
 0x244   : > { %v2438_v55 = vsel %vm2437_vm15, %v3223_v6, %v2434_v2  ;;  %v2446_v50 = vmul.f32 %v3229_v20, %v2387_v35  ;;  %3230 = vrcp.f32 %v2391_v19  ;;  %vm2451_vm2 = vweird.f32 %v3229_v20  ;;  %vm2497_vm4 = vmor %vm2495_vm3, %vm2496_vm1 }
 0x245   : > { %v2443_v62 = vsel %vm2440_vm0, %v2442_v22, %v2438_v55  ;;  %v2492_v12 = vsub.f32 1.0, %v2491_v61  ;;  %vm2452_vm7 = vmor %vm2450_vm5, %vm2451_vm2  ;;  %v2516_v18 = vand.u32 2147483648, %v2391_v19  ;;  %v2514_v46 = vand.u32 2147483647, %v2391_v19 }
 0x246   : > { %v2642_v44 = vmul.f32 %v2443_v62, %v4306_v60  ;;  %v2447_v48 = vsub.f32 1.0, %v2446_v50  ;;  %v2502_v60 = vor.u32 1.1754944e-38, %v2501_v38  ;;  %vm2510_vm10 = vweird.f32 %v2391_v19 }
 0x247   : > { %v2493_v37 = vmul.f32 %v3227_v14, %v2492_v12  ;;  %vm2515_vm12 = vcmp.eq.f32.partialorder %v2514_v46, 8.507059e+37 }
 0x248   : > { %v2658_v24 = vpack.c.bf16 %v2642_v44, %v2642_v44  ;;  %v2448_v7 = vmul.f32 %v3229_v20, %v2447_v48 }
 0x249   : > { %v2494_v16 = vadd.f32 %v3227_v14, %v2493_v37 }
 0x24a   : > { %v3231_v10 = vpop.eup %3230  ;;  %2675 = vst.msk [vmem:[%s3619_s15 + $0x8] sm:$0xf] %vm2672_vm13, %v2658_v24  ;;  %v2449_v30 = vadd.f32 %v3229_v20, %v2448_v7 }
 0x24b   : > { %v2498_v33 = vsel %vm2497_vm4, %v3227_v14, %v2494_v16  ;;  %v2506_v26 = vmul.f32 %v3231_v10, %v2391_v19  ;;  %vm2511_vm9 = vweird.f32 %v3231_v10 }
 0x24c   : > { %v2503_v21 = vsel %vm2500_vm6, %v2502_v60, %v2498_v33  ;;  %v2453_v23 = vsel %vm2452_vm7, %v3229_v20, %v2449_v30  ;;  %vm2512_vm11 = vmor %vm2510_vm10, %vm2511_vm9 }
 0x24d   : > { %v2646_v25 = vmul.f32 %v2503_v21, %v4311_v41  ;;  %v2458_v49 = vsel %vm2455_vm8, %v2457_v31, %v2453_v23  ;;  %v2507_v34 = vsub.f32 1.0, %v2506_v26  ;;  %v2517_v41 = vor.u32 1.1754944e-38, %v2516_v18 }
 0x24e   : > { %v2643_v39 = vmul.f32 %v2458_v49, %v4314_v32 }
 0x24f   : > { %v2662_v43 = vpack.c.bf16 %v2646_v25, %v2646_v25  ;;  %v2508_v45 = vmul.f32 %v3231_v10, %v2507_v34 }
 0x250   : > { %v2659_v27 = vpack.c.bf16 %v2643_v39, %v2643_v39 }
 0x251   : > { %2679 = vst.msk [vmem:[%s3619_s15 + $0x18] sm:$0xf] %vm2672_vm13, %v2662_v43  ;;  %v2509_v47 = vadd.f32 %v3231_v10, %v2508_v45 }
 0x252   : > { %2676 = vst.msk [vmem:[%s3619_s15 + $0xc] sm:$0xf] %vm2672_vm13, %v2659_v27 }
 0x253   : > { %v2513_v32 = vsel %vm2512_vm11, %v3231_v10, %v2509_v47 }
 0x254   : > { %v2518_v29 = vsel %vm2515_vm12, %v2517_v41, %v2513_v32 }
 0x255   : > { %v2647_v11 = vmul.f32 %v2518_v29, %v4322_v3 }
 0x257   : > { %v2663_v52 = vpack.c.bf16 %v2647_v11, %v2647_v11 }
 0x259   : > { %2680 = vst.msk [vmem:[%s3619_s15 + $0x1c] sm:$0xf] %vm2672_vm13, %v2663_v52 }
 0x25a   : > { %3259 = shalt.err (!%p3256_p1)
}
 0x25b   : > { %s3338_s12 = smov 4  }
 0x25c   : > { %3085 = dma.vmem_to_hbm [thread:$0]  (%p3420_p3), %s2706_s16, 1024, %s2708_s8, %s2690_s13, %s3337_s17, %s3337_s17, %s3338_s12  }
 0x25d PF: > { %p3091_p2 = scmp.ge.s32.totalorder %s3326_s25, 2  ;;  %s2722_s15 = sand.u32 1, %s3298_s18  }
 0x25e   : > { %s2723_s10 = scalar_lea.sflag [#allocation4], %s2722_s15 }
 0x25f   : > { %p3088_p4 = pnand %p3091_p2, %p3429_p8 }
 0x261   : > { %p3089_p5 = pneg %p3088_p4 }
 0x263   : > { %3293 = dma.done.wait (%p3089_p5), %s2723_s10, 1024  }
 0x264   : > { %3295 = vsyncadd (%p3089_p5), %s2723_s10, 4294966272  ;;  %s18_s25 = sadd.s32 1, %s3326_s25   ;;  %s4408_s18 = smov %s3302_s19 }
 0x265   : > { %p15_p6 = scmp.ge.s32.totalorder %s18_s25, 6   ;;  %s4409_s19 = smov %s3306_s20 }
 0x266   : > { %s4410_s20 = smov %s3438_s11  ;;  %s4411_s21 = smov %s3318_s23 }
 0x267   : > { %s4412_s22 = smov %s3322_s24  ;;  %s4413_s23 = smov %s4416_s28 }
 0x268   : > { %s4414_s24 = smov %s4420_s29  ;;  %17 = sbr.rel (!%p15_p6) target bundleno = 5 (0x5), region = 101 }
 0x26d   :  { %2729 = vsyncpa [#allocation4], 1 }
 0x26e   :  { %2731 = vsyncpa [#allocation4 + $0x1], 1 }

</bundles_post_ra>
